<compile_context>
chip_gen: v7x
topology: tpu7x:2x2x1
jax: 0.10.0
libtpu: 0.0.40
codegen_flags: <defaults>
</compile_context>

<pallas_src>
import math
import functools

import jax
import jax.numpy as jnp
import numpy as np
from jax.experimental import pallas as pl
from jax.experimental.pallas import tpu as pltpu


_NEG_INF = -1e30  # large finite negative instead of -inf (avoids NaN on masked rows)


def _fused_causal_attn_kernel(x_q_ref, x_kv_ref,
                              w_q_ref, w_k_ref, w_v_ref,
                              b_q_ref, b_k_ref, b_v_ref,
                              w_proj_ref, b_proj_ref,
                              o_ref,
                              q_scr, k_cache, v_cache, m_scr, l_scr, acc_scr,
                              *, n_head: int):
    """Grid = (batch, q_tile, kv_tile). Online softmax carried across the kv axis;
    K/V projections cached per batch in VMEM scratch (filled on the qi == 0 row)."""
    qi = pl.program_id(1)
    ki = pl.program_id(2)

    H = n_head
    TQ = q_scr.shape[1]
    hd = q_scr.shape[2]
    TK = k_cache.shape[2]
    C = H * hd
    scale = float(1.0 / math.sqrt(hd))
    dtype = x_q_ref.dtype  # feed the MXU in the native input dtype

    # ---- K/V projection cache fill: once per (batch, kv tile) ----------------
    # Runs on the qi == 0 row, which visits every kv tile exactly once per batch
    # (re-using grid points that the causal skip would otherwise waste).
    @pl.when(qi == 0)
    def _project_kv():
        x_kv = x_kv_ref[0]                                             # (TK, C)
        k2d = jnp.dot(x_kv, w_k_ref[...],
                      preferred_element_type=jnp.float32) + b_k_ref[...]
        v2d = jnp.dot(x_kv, w_v_ref[...],
                      preferred_element_type=jnp.float32) + b_v_ref[...]
        # One reshape+transpose to head-major; no per-head lane slices.
        k_cache[ki] = jnp.swapaxes(k2d.reshape(TK, H, hd), 0, 1).astype(dtype)
        v_cache[ki] = jnp.swapaxes(v2d.reshape(TK, H, hd), 0, 1).astype(dtype)

    # ---- Q projection + softmax-state reset: once per (batch, q tile) --------
    @pl.when(ki == 0)
    def _project_q_and_reset():
        x_q = x_q_ref[0]                                               # (TQ, C)
        q2d = (jnp.dot(x_q, w_q_ref[...],
                       preferred_element_type=jnp.float32)
               + b_q_ref[...]) * scale                                 # (TQ, C) f32
        q_scr[...] = jnp.swapaxes(q2d.reshape(TQ, H, hd), 0, 1).astype(dtype)
        m_scr[...] = jnp.full((H, TQ, 1), _NEG_INF, dtype=jnp.float32)
        l_scr[...] = jnp.zeros((H, TQ, 1), dtype=jnp.float32)
        acc_scr[...] = jnp.zeros((H, TQ, hd), dtype=jnp.float32)

    # ---- one online-softmax update against the current (cached) KV tile ------
    def _attend(apply_mask):
        kh = k_cache[ki]                                               # (H, TK, hd)
        vh = v_cache[ki]                                               # (H, TK, hd)
        qh = q_scr[...]                                                # (H, TQ, hd), pre-scaled
        s = jnp.einsum("htd,hsd->hts", qh, kh,
                       preferred_element_type=jnp.float32)             # (H, TQ, TK) f32

        if apply_mask:  # only the diagonal tile needs the causal mask (TQ == TK)
            row = jax.lax.broadcasted_iota(jnp.int32, (TQ, TK), 0)
            col = jax.lax.broadcasted_iota(jnp.int32, (TQ, TK), 1)
            s = jnp.where((row >= col)[None, :, :], s, _NEG_INF)

        m_prev = m_scr[...]
        m_new = jnp.maximum(m_prev, jnp.max(s, axis=-1, keepdims=True))
        alpha = jnp.exp(m_prev - m_new)
        p = jnp.exp(s - m_new)                                         # (H, TQ, TK) f32
        l_scr[...] = alpha * l_scr[...] + jnp.sum(p, axis=-1, keepdims=True)
        acc_scr[...] = alpha * acc_scr[...] + jnp.einsum(
            "hts,hsd->htd", p.astype(dtype), vh,
            preferred_element_type=jnp.float32)
        m_scr[...] = m_new

    @pl.when(ki < qi)            # strictly-below-diagonal tiles: no mask needed
    def _attend_full():
        _attend(apply_mask=False)

    @pl.when(ki == qi)           # diagonal tile: mask, then finalize this q tile
    def _attend_diag_and_finalize():
        _attend(apply_mask=True)
        # Deferred normalization: one approximate (EUP) reciprocal per q tile.
        inv_l = pl.reciprocal(l_scr[...], approx=True)                 # (H, TQ, 1)
        y = (acc_scr[...] * inv_l).astype(dtype)                       # (H, TQ, hd)
        # Fold heads straight into the output projection (no concatenate).
        y2d = jnp.swapaxes(y, 0, 1).reshape(TQ, C)                     # (TQ, C)
        out = jnp.dot(y2d, w_proj_ref[...],
                      preferred_element_type=jnp.float32) + b_proj_ref[...]
        o_ref[0] = out.astype(o_ref.dtype)
    # KV tiles with ki > qi (and qi > 0) do no attention / projection work at all.


def _pick_tile(T):
    """Sequence tile: 256 on v6e/v7x-class chips, 128 on v5e, clamped to divide T."""
    try:
        kind = jax.devices()[0].device_kind.lower()
    except Exception:
        kind = ""
    cap = 128 if ("v5 lite" in kind or "v5e" in kind) else 256
    if T <= cap:
        return T
    for t in range(cap, 7, -8):          # largest multiple of 8 dividing T
        if T % t == 0:
            return t
    return T


def causal_self_attention(x, w_qkv, b_qkv, w_proj, b_proj, *, n_head: int,
                          seq_tile=None):
    """x: (B, T, C). w_qkv: (C, 3C), b_qkv: (1, 3C), w_proj: (C, C), b_proj: (1, C)."""
    B, T, C = x.shape
    assert C % n_head == 0
    hd = C // n_head

    tile = seq_tile if seq_tile is not None else _pick_tile(T)
    assert T % tile == 0, f"sequence length {T} must be divisible by tile {tile}"
    TQ = TK = tile
    num_q = T // TQ
    num_k = T // TK

    # Split the fused QKV parameters on the host so the kernel never slices
    # narrow, lane-unaligned columns.
    w_q, w_k, w_v = w_qkv[:, 0:C], w_qkv[:, C:2 * C], w_qkv[:, 2 * C:3 * C]
    b_q, b_k, b_v = b_qkv[:, 0:C], b_qkv[:, C:2 * C], b_qkv[:, 2 * C:3 * C]

    kernel = functools.partial(_fused_causal_attn_kernel, n_head=n_head)

    # Resident (single-copy, non-pipelined) VMEM placement for constant params.
    resident = pl.BlockSpec(memory_space=pltpu.MemorySpace.VMEM)

    # KV-tile input is only consumed on the qi == 0 row (cache fill); pin the DMA
    # to block 0 afterwards so no redundant HBM reads are issued for qi > 0.
    def x_kv_index_map(b, qi, ki):
        return (b, jnp.where(qi == 0, ki, 0), 0)

    itemsize = x.dtype.itemsize
    cost = pl.CostEstimate(
        flops=int(2 * B * T * C * 3 * C                 # qkv projection (once)
                  + 2 * B * T * T * C                   # QK^T and PV (causal half)
                  + 2 * B * T * C * C),                 # output projection
        transcendentals=int(B * n_head * T * T // 2),
        bytes_accessed=int((2 * B * T * C + 4 * C * C + 4 * C) * itemsize),
    )

    return pl.pallas_call(
        kernel,
        out_shape=jax.ShapeDtypeStruct((B, T, C), x.dtype),
        grid_spec=pltpu.PrefetchScalarGridSpec(
            num_scalar_prefetch=0,
            grid=(B, num_q, num_k),
            in_specs=[
                pl.BlockSpec((1, TQ, C), lambda b, qi, ki: (b, qi, 0)),  # x (q rows)
                pl.BlockSpec((1, TK, C), x_kv_index_map),                # x (kv rows)
                resident, resident, resident,                            # w_q, w_k, w_v
                resident, resident, resident,                            # b_q, b_k, b_v
                resident, resident,                                      # w_proj, b_proj
            ],
            out_specs=pl.BlockSpec((1, TQ, C), lambda b, qi, ki: (b, qi, 0)),
            scratch_shapes=[
                pltpu.VMEM((n_head, TQ, hd), x.dtype),          # q (scaled, head-major)
                pltpu.VMEM((num_k, n_head, TK, hd), x.dtype),   # K cache (whole seq)
                pltpu.VMEM((num_k, n_head, TK, hd), x.dtype),   # V cache (whole seq)
                pltpu.VMEM((n_head, TQ, 1), jnp.float32),       # running max m
                pltpu.VMEM((n_head, TQ, 1), jnp.float32),       # running denom l
                pltpu.VMEM((n_head, TQ, hd), jnp.float32),      # output accumulator
            ],
        ),
        compiler_params=pltpu.CompilerParams(
            # q-tile axis must stay sequential per core: the K/V cache is filled
            # on the qi == 0 row and reused by later q tiles of the same batch.
            dimension_semantics=("parallel", "arbitrary", "arbitrary"),
            vmem_limit_bytes=64 * 1024 * 1024,
        ),
        cost_estimate=cost,
    )(x, x, w_q, w_k, w_v, b_q, b_k, b_v, w_proj, b_proj)


def reference(x, w_qkv, b_qkv, w_proj, b_proj, n_head):
    """Plain-JAX reference mirroring the PyTorch forward pass."""
    B, T, C = x.shape
    hd = C // n_head
    qkv = x @ w_qkv + b_qkv[0]                               # (B, T, 3C)
    q, k, v = jnp.split(qkv, 3, axis=2)
    q = q.reshape(B, T, n_head, hd).transpose(0, 2, 1, 3)    # (B, H, T, hd)
    k = k.reshape(B, T, n_head, hd).transpose(0, 2, 1, 3)
    v = v.reshape(B, T, n_head, hd).transpose(0, 2, 1, 3)
    att = jnp.einsum("bhqd,bhkd->bhqk", q, k) * (1.0 / math.sqrt(hd))
    mask = jnp.tril(jnp.ones((T, T), dtype=bool))
    att = jnp.where(mask[None, None], att, -jnp.inf)
    att = jax.nn.softmax(att, axis=-1)
    y = jnp.einsum("bhqk,bhkd->bhqd", att, v)
    y = y.transpose(0, 2, 1, 3).reshape(B, T, C)
    return y @ w_proj + b_proj[0]


if __name__ == "__main__":
    # Small config consistent with the module (n_embd % n_head == 0, T <= block_size).
    B, T, C, n_head = 2, 16, 32, 4

    key = jax.random.PRNGKey(0)
    k_x, k_w1, k_b1, k_w2, k_b2 = jax.random.split(key, 5)

    x = jax.random.normal(k_x, (B, T, C), dtype=jnp.float32)

    bound1 = 1.0 / math.sqrt(C)
    w_qkv = jax.random.uniform(k_w1, (C, 3 * C), minval=-bound1, maxval=bound1,
                               dtype=jnp.float32)
    b_qkv = jax.random.uniform(k_b1, (1, 3 * C), minval=-bound1, maxval=bound1,
                               dtype=jnp.float32)
    w_proj = jax.random.uniform(k_w2, (C, C), minval=-bound1, maxval=bound1,
                                dtype=jnp.float32)
    b_proj = jax.random.uniform(k_b2, (1, C), minval=-bound1, maxval=bound1,
                                dtype=jnp.float32)

    ref = reference(x, w_qkv, b_qkv, w_proj, b_proj, n_head)

    # Multi-tile path: 2x2 (q, kv) tiles per batch -> exercises the K/V cache fill
    # across two kv tiles, cache reuse by the second q tile, the unmasked
    # off-diagonal tile, the masked diagonal tile and causal skipping.
    out_tiled = causal_self_attention(x, w_qkv, b_qkv, w_proj, b_proj,
                                      n_head=n_head, seq_tile=8)
    out_tiled = jax.block_until_ready(out_tiled)
    # Tolerance accounts for the approximate (EUP) reciprocal used for normalization.
    np.testing.assert_allclose(np.asarray(out_tiled), np.asarray(ref),
                               rtol=5e-3, atol=5e-3)

    # Default tile selection (whole sequence fits in a single tile at this size).
    out_default = causal_self_attention(x, w_qkv, b_qkv, w_proj, b_proj,
                                        n_head=n_head)
    out_default = jax.block_until_ready(out_default)
    np.testing.assert_allclose(np.asarray(out_default), np.asarray(ref),
                               rtol=5e-3, atol=5e-3)

    print("KERNEL_OK")
</pallas_src>

<mosaic_0001>
module attributes {stable_mosaic.version = 11 : i64} {
  func.func @_fused_causal_attn_kernel(%arg0: i32, %arg1: i32, %arg2: i32, %arg3: memref<1x8x32xf32, #tpu.memory_space<vmem>>, %arg4: memref<1x8x32xf32, #tpu.memory_space<vmem>>, %arg5: memref<32x32xf32, #tpu.memory_space<vmem>>, %arg6: memref<32x32xf32, #tpu.memory_space<vmem>>, %arg7: memref<32x32xf32, #tpu.memory_space<vmem>>, %arg8: memref<1x32xf32, #tpu.memory_space<vmem>>, %arg9: memref<1x32xf32, #tpu.memory_space<vmem>>, %arg10: memref<1x32xf32, #tpu.memory_space<vmem>>, %arg11: memref<32x32xf32, #tpu.memory_space<vmem>>, %arg12: memref<1x32xf32, #tpu.memory_space<vmem>>, %arg13: memref<1x8x32xf32, #tpu.memory_space<vmem>>, %arg14: memref<4x8x8xf32, #tpu.memory_space<vmem>>, %arg15: memref<2x4x8x8xf32, #tpu.memory_space<vmem>>, %arg16: memref<2x4x8x8xf32, #tpu.memory_space<vmem>>, %arg17: memref<4x8x1xf32, #tpu.memory_space<vmem>>, %arg18: memref<4x8x1xf32, #tpu.memory_space<vmem>>, %arg19: memref<4x8x8xf32, #tpu.memory_space<vmem>>) attributes {dimension_semantics = [#tpu.dimension_semantics<parallel>, #tpu.dimension_semantics<arbitrary>, #tpu.dimension_semantics<arbitrary>], iteration_bounds = array<i64: 2, 2, 2>, scalar_prefetch = 0 : i64, scratch_operands = 6 : i64, tpu.core_type = #tpu.core_type<tc>, window_params = [{transform_indices = @transform_0, window_bounds = array<i64: 1, 8, 32>}, {transform_indices = @transform_1, window_bounds = array<i64: 1, 8, 32>}, {pipeline_mode = #tpu.pipeline_mode<synchronous>, transform_indices = @transform_2, window_bounds = array<i64: 32, 32>}, {pipeline_mode = #tpu.pipeline_mode<synchronous>, transform_indices = @transform_3, window_bounds = array<i64: 32, 32>}, {pipeline_mode = #tpu.pipeline_mode<synchronous>, transform_indices = @transform_4, window_bounds = array<i64: 32, 32>}, {pipeline_mode = #tpu.pipeline_mode<synchronous>, transform_indices = @transform_5, window_bounds = array<i64: 1, 32>}, {pipeline_mode = #tpu.pipeline_mode<synchronous>, transform_indices = @transform_6, window_bounds = array<i64: 1, 32>}, {pipeline_mode = #tpu.pipeline_mode<synchronous>, transform_indices = @transform_7, window_bounds = array<i64: 1, 32>}, {pipeline_mode = #tpu.pipeline_mode<synchronous>, transform_indices = @transform_8, window_bounds = array<i64: 32, 32>}, {pipeline_mode = #tpu.pipeline_mode<synchronous>, transform_indices = @transform_9, window_bounds = array<i64: 1, 32>}, {transform_indices = @transform_10, window_bounds = array<i64: 1, 8, 32>}]} {
    %c0_i32 = arith.constant 0 : i32
    %0 = arith.cmpi eq, %arg1, %c0_i32 : i32
    %1 = arith.extui %0 : i1 to i32
    %c0_i32_0 = arith.constant 0 : i32
    %2 = arith.cmpi ne, %1, %c0_i32_0 : i32
    scf.if %2 {
      %c0 = arith.constant 0 : index
      %c0_5 = arith.constant 0 : index
      %c0_6 = arith.constant 0 : index
      %12 = vector.load %arg4[%c0, %c0_5, %c0_6] : memref<1x8x32xf32, #tpu.memory_space<vmem>>, vector<1x8x32xf32>
      %13 = vector.shape_cast %12 : vector<1x8x32xf32> to vector<8x32xf32>
      %c0_7 = arith.constant 0 : index
      %c0_8 = arith.constant 0 : index
      %14 = vector.load %arg6[%c0_7, %c0_8] : memref<32x32xf32, #tpu.memory_space<vmem>>, vector<32x32xf32>
      %cst = arith.constant dense<0.000000e+00> : vector<8x32xf32>
      %15 = tpu.matmul %13, %14, %cst {dimension_numbers = #tpu.dot_dimension_numbers<[1], [0], [0], [1], [0, 0, 1, 1], [], []>} : vector<8x32xf32>, vector<32x32xf32>, vector<8x32xf32> -> vector<8x32xf32>
      %c0_9 = arith.constant 0 : index
      %c0_10 = arith.constant 0 : index
      %16 = vector.load %arg9[%c0_9, %c0_10] : memref<1x32xf32, #tpu.memory_space<vmem>>, vector<1x32xf32>
      %17 = vector.broadcast %16 : vector<1x32xf32> to vector<8x32xf32>
      %18 = arith.addf %15, %17 : vector<8x32xf32>
      %c0_11 = arith.constant 0 : index
      %c0_12 = arith.constant 0 : index
      %19 = vector.load %arg7[%c0_11, %c0_12] : memref<32x32xf32, #tpu.memory_space<vmem>>, vector<32x32xf32>
      %cst_13 = arith.constant dense<0.000000e+00> : vector<8x32xf32>
      %20 = tpu.matmul %13, %19, %cst_13 {dimension_numbers = #tpu.dot_dimension_numbers<[1], [0], [0], [1], [0, 0, 1, 1], [], []>} : vector<8x32xf32>, vector<32x32xf32>, vector<8x32xf32> -> vector<8x32xf32>
      %c0_14 = arith.constant 0 : index
      %c0_15 = arith.constant 0 : index
      %21 = vector.load %arg10[%c0_14, %c0_15] : memref<1x32xf32, #tpu.memory_space<vmem>>, vector<1x32xf32>
      %22 = vector.broadcast %21 : vector<1x32xf32> to vector<8x32xf32>
      %23 = arith.addf %20, %22 : vector<8x32xf32>
      %24 = vector.shape_cast %18 : vector<8x32xf32> to vector<8x4x8xf32>
      %25 = tpu.transpose %24, [1, 0, 2] : vector<8x4x8xf32> -> vector<4x8x8xf32>
      %26 = arith.index_cast %arg2 : i32 to index
      %c0_16 = arith.constant 0 : index
      %c0_17 = arith.constant 0 : index
      %c0_18 = arith.constant 0 : index
      %27 = vector.load %arg15[%26, %c0_16, %c0_17, %c0_18] : memref<2x4x8x8xf32, #tpu.memory_space<vmem>>, vector<1x4x8x8xf32>
      %28 = vector.shape_cast %27 : vector<1x4x8x8xf32> to vector<4x8x8xf32>
      %29 = vector.shape_cast %25 : vector<4x8x8xf32> to vector<1x4x8x8xf32>
      tpu.vector_store %arg15[%26, %c0_16, %c0_17, %c0_18], %29 {strides = array<i32>} : memref<2x4x8x8xf32, #tpu.memory_space<vmem>>, vector<1x4x8x8xf32>,
      %30 = vector.shape_cast %23 : vector<8x32xf32> to vector<8x4x8xf32>
      %31 = tpu.transpose %30, [1, 0, 2] : vector<8x4x8xf32> -> vector<4x8x8xf32>
      %32 = arith.index_cast %arg2 : i32 to index
      %c0_19 = arith.constant 0 : index
      %c0_20 = arith.constant 0 : index
      %c0_21 = arith.constant 0 : index
      %33 = vector.load %arg16[%32, %c0_19, %c0_20, %c0_21] : memref<2x4x8x8xf32, #tpu.memory_space<vmem>>, vector<1x4x8x8xf32>
      %34 = vector.shape_cast %33 : vector<1x4x8x8xf32> to vector<4x8x8xf32>
      %35 = vector.shape_cast %31 : vector<4x8x8xf32> to vector<1x4x8x8xf32>
      tpu.vector_store %arg16[%32, %c0_19, %c0_20, %c0_21], %35 {strides = array<i32>} : memref<2x4x8x8xf32, #tpu.memory_space<vmem>>, vector<1x4x8x8xf32>,
    } else {
    }
    %c0_i32_1 = arith.constant 0 : i32
    %3 = arith.cmpi eq, %arg2, %c0_i32_1 : i32
    %4 = arith.extui %3 : i1 to i32
    %c0_i32_2 = arith.constant 0 : i32
    %5 = arith.cmpi ne, %4, %c0_i32_2 : i32
    scf.if %5 {
      %c0 = arith.constant 0 : index
      %c0_5 = arith.constant 0 : index
      %c0_6 = arith.constant 0 : index
      %12 = vector.load %arg3[%c0, %c0_5, %c0_6] : memref<1x8x32xf32, #tpu.memory_space<vmem>>, vector<1x8x32xf32>
      %13 = vector.shape_cast %12 : vector<1x8x32xf32> to vector<8x32xf32>
      %c0_7 = arith.constant 0 : index
      %c0_8 = arith.constant 0 : index
      %14 = vector.load %arg5[%c0_7, %c0_8] : memref<32x32xf32, #tpu.memory_space<vmem>>, vector<32x32xf32>
      %cst = arith.constant dense<0.000000e+00> : vector<8x32xf32>
      %15 = tpu.matmul %13, %14, %cst {dimension_numbers = #tpu.dot_dimension_numbers<[1], [0], [0], [1], [0, 0, 1, 1], [], []>} : vector<8x32xf32>, vector<32x32xf32>, vector<8x32xf32> -> vector<8x32xf32>
      %c0_9 = arith.constant 0 : index
      %c0_10 = arith.constant 0 : index
      %16 = vector.load %arg8[%c0_9, %c0_10] : memref<1x32xf32, #tpu.memory_space<vmem>>, vector<1x32xf32>
      %17 = vector.broadcast %16 : vector<1x32xf32> to vector<8x32xf32>
      %18 = arith.addf %15, %17 : vector<8x32xf32>
      %cst_11 = arith.constant 0.353553385 : f32
      %19 = vector.broadcast %cst_11 : f32 to vector<8x32xf32>
      %20 = arith.mulf %18, %19 : vector<8x32xf32>
      %21 = vector.shape_cast %20 : vector<8x32xf32> to vector<8x4x8xf32>
      %22 = tpu.transpose %21, [1, 0, 2] : vector<8x4x8xf32> -> vector<4x8x8xf32>
      %c0_12 = arith.constant 0 : index
      %c0_13 = arith.constant 0 : index
      %c0_14 = arith.constant 0 : index
      %23 = vector.load %arg14[%c0_12, %c0_13, %c0_14] : memref<4x8x8xf32, #tpu.memory_space<vmem>>, vector<4x8x8xf32>
      tpu.vector_store %arg14[%c0_12, %c0_13, %c0_14], %22 {strides = array<i32>} : memref<4x8x8xf32, #tpu.memory_space<vmem>>, vector<4x8x8xf32>,
      %cst_15 = arith.constant -1.000000e+30 : f32
      %24 = vector.broadcast %cst_15 : f32 to vector<4x8x1xf32>
      %c0_16 = arith.constant 0 : index
      %c0_17 = arith.constant 0 : index
      %c0_18 = arith.constant 0 : index
      %25 = vector.load %arg17[%c0_16, %c0_17, %c0_18] : memref<4x8x1xf32, #tpu.memory_space<vmem>>, vector<4x8x1xf32>
      tpu.vector_store %arg17[%c0_16, %c0_17, %c0_18], %24 {strides = array<i32>} : memref<4x8x1xf32, #tpu.memory_space<vmem>>, vector<4x8x1xf32>,
      %cst_19 = arith.constant 0.000000e+00 : f32
      %26 = vector.broadcast %cst_19 : f32 to vector<4x8x1xf32>
      %c0_20 = arith.constant 0 : index
      %c0_21 = arith.constant 0 : index
      %c0_22 = arith.constant 0 : index
      %27 = vector.load %arg18[%c0_20, %c0_21, %c0_22] : memref<4x8x1xf32, #tpu.memory_space<vmem>>, vector<4x8x1xf32>
      tpu.vector_store %arg18[%c0_20, %c0_21, %c0_22], %26 {strides = array<i32>} : memref<4x8x1xf32, #tpu.memory_space<vmem>>, vector<4x8x1xf32>,
      %cst_23 = arith.constant 0.000000e+00 : f32
      %28 = vector.broadcast %cst_23 : f32 to vector<4x8x8xf32>
      %c0_24 = arith.constant 0 : index
      %c0_25 = arith.constant 0 : index
      %c0_26 = arith.constant 0 : index
      %29 = vector.load %arg19[%c0_24, %c0_25, %c0_26] : memref<4x8x8xf32, #tpu.memory_space<vmem>>, vector<4x8x8xf32>
      tpu.vector_store %arg19[%c0_24, %c0_25, %c0_26], %28 {strides = array<i32>} : memref<4x8x8xf32, #tpu.memory_space<vmem>>, vector<4x8x8xf32>,
    } else {
    }
    %6 = arith.cmpi slt, %arg2, %arg1 : i32
    %7 = arith.extui %6 : i1 to i32
    %c0_i32_3 = arith.constant 0 : i32
    %8 = arith.cmpi ne, %7, %c0_i32_3 : i32
    scf.if %8 {
      %12 = arith.index_cast %arg2 : i32 to index
      %c0 = arith.constant 0 : index
      %c0_5 = arith.constant 0 : index
      %c0_6 = arith.constant 0 : index
      %13 = vector.load %arg15[%12, %c0, %c0_5, %c0_6] : memref<2x4x8x8xf32, #tpu.memory_space<vmem>>, vector<1x4x8x8xf32>
      %14 = vector.shape_cast %13 : vector<1x4x8x8xf32> to vector<4x8x8xf32>
      %15 = arith.index_cast %arg2 : i32 to index
      %c0_7 = arith.constant 0 : index
      %c0_8 = arith.constant 0 : index
      %c0_9 = arith.constant 0 : index
      %16 = vector.load %arg16[%15, %c0_7, %c0_8, %c0_9] : memref<2x4x8x8xf32, #tpu.memory_space<vmem>>, vector<1x4x8x8xf32>
      %17 = vector.shape_cast %16 : vector<1x4x8x8xf32> to vector<4x8x8xf32>
      %c0_10 = arith.constant 0 : index
      %c0_11 = arith.constant 0 : index
      %c0_12 = arith.constant 0 : index
      %18 = vector.load %arg14[%c0_10, %c0_11, %c0_12] : memref<4x8x8xf32, #tpu.memory_space<vmem>>, vector<4x8x8xf32>
      "tpu.trace_start"() <{level = 10 : i32, message = "htd,hsd->hts"}> : () -> ()
      %cst = arith.constant dense<0.000000e+00> : vector<4x8x8xf32>
      %19 = tpu.matmul %18, %14, %cst {dimension_numbers = #tpu.dot_dimension_numbers<[2], [2], [1], [1], [0, 0, 0, 1, 1, 1], [0], [0]>} : vector<4x8x8xf32>, vector<4x8x8xf32>, vector<4x8x8xf32> -> vector<4x8x8xf32>
      "tpu.trace_stop"() : () -> ()
      %c0_13 = arith.constant 0 : index
      %c0_14 = arith.constant 0 : index
      %c0_15 = arith.constant 0 : index
      %20 = vector.load %arg17[%c0_13, %c0_14, %c0_15] : memref<4x8x1xf32, #tpu.memory_space<vmem>>, vector<4x8x1xf32>
      %cst_16 = arith.constant dense<0xFF800000> : vector<4x8xf32>
      %21 = vector.multi_reduction <maximumf>, %19, %cst_16 [2] : vector<4x8x8xf32> to vector<4x8xf32>
      %22 = vector.shape_cast %21 : vector<4x8xf32> to vector<4x8x1xf32>
      %23 = arith.maximumf %20, %22 : vector<4x8x1xf32>
      %24 = arith.subf %20, %23 : vector<4x8x1xf32>
      %25 = math.exp %24 : vector<4x8x1xf32>
      %26 = vector.broadcast %23 : vector<4x8x1xf32> to vector<4x8x8xf32>
      %27 = arith.subf %19, %26 : vector<4x8x8xf32>
      %28 = math.exp %27 : vector<4x8x8xf32>
      %c0_17 = arith.constant 0 : index
      %c0_18 = arith.constant 0 : index
      %c0_19 = arith.constant 0 : index
      %29 = vector.load %arg18[%c0_17, %c0_18, %c0_19] : memref<4x8x1xf32, #tpu.memory_space<vmem>>, vector<4x8x1xf32>
      %30 = arith.mulf %25, %29 : vector<4x8x1xf32>
      %cst_20 = arith.constant dense<0.000000e+00> : vector<4x8xf32>
      %31 = vector.multi_reduction <add>, %28, %cst_20 [2] : vector<4x8x8xf32> to vector<4x8xf32>
      %32 = vector.shape_cast %31 : vector<4x8xf32> to vector<4x8x1xf32>
      %33 = arith.addf %30, %32 : vector<4x8x1xf32>
      %c0_21 = arith.constant 0 : index
      %c0_22 = arith.constant 0 : index
      %c0_23 = arith.constant 0 : index
      %34 = vector.load %arg18[%c0_21, %c0_22, %c0_23] : memref<4x8x1xf32, #tpu.memory_space<vmem>>, vector<4x8x1xf32>
      tpu.vector_store %arg18[%c0_21, %c0_22, %c0_23], %33 {strides = array<i32>} : memref<4x8x1xf32, #tpu.memory_space<vmem>>, vector<4x8x1xf32>,
      %c0_24 = arith.constant 0 : index
      %c0_25 = arith.constant 0 : index
      %c0_26 = arith.constant 0 : index
      %35 = vector.load %arg19[%c0_24, %c0_25, %c0_26] : memref<4x8x8xf32, #tpu.memory_space<vmem>>, vector<4x8x8xf32>
      %36 = vector.broadcast %25 : vector<4x8x1xf32> to vector<4x8x8xf32>
      %37 = arith.mulf %36, %35 : vector<4x8x8xf32>
      "tpu.trace_start"() <{level = 10 : i32, message = "hts,hsd->htd"}> : () -> ()
      %cst_27 = arith.constant dense<0.000000e+00> : vector<4x8x8xf32>
      %38 = tpu.matmul %28, %17, %cst_27 {dimension_numbers = #tpu.dot_dimension_numbers<[2], [1], [1], [2], [0, 0, 0, 1, 1, 2], [0], [0]>} : vector<4x8x8xf32>, vector<4x8x8xf32>, vector<4x8x8xf32> -> vector<4x8x8xf32>
      "tpu.trace_stop"() : () -> ()
      %39 = arith.addf %37, %38 : vector<4x8x8xf32>
      %c0_28 = arith.constant 0 : index
      %c0_29 = arith.constant 0 : index
      %c0_30 = arith.constant 0 : index
      %40 = vector.load %arg19[%c0_28, %c0_29, %c0_30] : memref<4x8x8xf32, #tpu.memory_space<vmem>>, vector<4x8x8xf32>
      tpu.vector_store %arg19[%c0_28, %c0_29, %c0_30], %39 {strides = array<i32>} : memref<4x8x8xf32, #tpu.memory_space<vmem>>, vector<4x8x8xf32>,
      %c0_31 = arith.constant 0 : index
      %c0_32 = arith.constant 0 : index
      %c0_33 = arith.constant 0 : index
      %41 = vector.load %arg17[%c0_31, %c0_32, %c0_33] : memref<4x8x1xf32, #tpu.memory_space<vmem>>, vector<4x8x1xf32>
      tpu.vector_store %arg17[%c0_31, %c0_32, %c0_33], %23 {strides = array<i32>} : memref<4x8x1xf32, #tpu.memory_space<vmem>>, vector<4x8x1xf32>,
    } else {
    }
    %9 = arith.cmpi eq, %arg2, %arg1 : i32
    %10 = arith.extui %9 : i1 to i32
    %c0_i32_4 = arith.constant 0 : i32
    %11 = arith.cmpi ne, %10, %c0_i32_4 : i32
    scf.if %11 {
      %12 = arith.index_cast %arg2 : i32 to index
      %c0 = arith.constant 0 : index
      %c0_5 = arith.constant 0 : index
      %c0_6 = arith.constant 0 : index
      %13 = vector.load %arg15[%12, %c0, %c0_5, %c0_6] : memref<2x4x8x8xf32, #tpu.memory_space<vmem>>, vector<1x4x8x8xf32>
      %14 = vector.shape_cast %13 : vector<1x4x8x8xf32> to vector<4x8x8xf32>
      %15 = arith.index_cast %arg2 : i32 to index
      %c0_7 = arith.constant 0 : index
      %c0_8 = arith.constant 0 : index
      %c0_9 = arith.constant 0 : index
      %16 = vector.load %arg16[%15, %c0_7, %c0_8, %c0_9] : memref<2x4x8x8xf32, #tpu.memory_space<vmem>>, vector<1x4x8x8xf32>
      %17 = vector.shape_cast %16 : vector<1x4x8x8xf32> to vector<4x8x8xf32>
      %c0_10 = arith.constant 0 : index
      %c0_11 = arith.constant 0 : index
      %c0_12 = arith.constant 0 : index
      %18 = vector.load %arg14[%c0_10, %c0_11, %c0_12] : memref<4x8x8xf32, #tpu.memory_space<vmem>>, vector<4x8x8xf32>
      "tpu.trace_start"() <{level = 10 : i32, message = "htd,hsd->hts"}> : () -> ()
      %cst = arith.constant dense<0.000000e+00> : vector<4x8x8xf32>
      %19 = tpu.matmul %18, %14, %cst {dimension_numbers = #tpu.dot_dimension_numbers<[2], [2], [1], [1], [0, 0, 0, 1, 1, 1], [0], [0]>} : vector<4x8x8xf32>, vector<4x8x8xf32>, vector<4x8x8xf32> -> vector<4x8x8xf32>
      "tpu.trace_stop"() : () -> ()
      %20 = tpu.iota {dimensions = array<i32: 0>} : vector<8x8xi32>
      %21 = tpu.iota {dimensions = array<i32: 1>} : vector<8x8xi32>
      %22 = arith.cmpi sge, %20, %21 : vector<8x8xi32>
      %23 = vector.shape_cast %22 : vector<8x8xi1> to vector<1x8x8xi1>
      %cst_13 = arith.constant -1.000000e+30 : f32
      %24 = vector.shape_cast %23 : vector<1x8x8xi1> to vector<1x8x8xi1>
      %25 = vector.broadcast %24 : vector<1x8x8xi1> to vector<4x8x8xi1>
      %26 = vector.broadcast %cst_13 : f32 to vector<4x8x8xf32>
      %27 = arith.select %25, %19, %26 : vector<4x8x8xi1>, vector<4x8x8xf32>
      %c0_14 = arith.constant 0 : index
      %c0_15 = arith.constant 0 : index
      %c0_16 = arith.constant 0 : index
      %28 = vector.load %arg17[%c0_14, %c0_15, %c0_16] : memref<4x8x1xf32, #tpu.memory_space<vmem>>, vector<4x8x1xf32>
      %cst_17 = arith.constant dense<0xFF800000> : vector<4x8xf32>
      %29 = vector.multi_reduction <maximumf>, %27, %cst_17 [2] : vector<4x8x8xf32> to vector<4x8xf32>
      %30 = vector.shape_cast %29 : vector<4x8xf32> to vector<4x8x1xf32>
      %31 = arith.maximumf %28, %30 : vector<4x8x1xf32>
      %32 = arith.subf %28, %31 : vector<4x8x1xf32>
      %33 = math.exp %32 : vector<4x8x1xf32>
      %34 = vector.broadcast %31 : vector<4x8x1xf32> to vector<4x8x8xf32>
      %35 = arith.subf %27, %34 : vector<4x8x8xf32>
      %36 = math.exp %35 : vector<4x8x8xf32>
      %c0_18 = arith.constant 0 : index
      %c0_19 = arith.constant 0 : index
      %c0_20 = arith.constant 0 : index
      %37 = vector.load %arg18[%c0_18, %c0_19, %c0_20] : memref<4x8x1xf32, #tpu.memory_space<vmem>>, vector<4x8x1xf32>
      %38 = arith.mulf %33, %37 : vector<4x8x1xf32>
      %cst_21 = arith.constant dense<0.000000e+00> : vector<4x8xf32>
      %39 = vector.multi_reduction <add>, %36, %cst_21 [2] : vector<4x8x8xf32> to vector<4x8xf32>
      %40 = vector.shape_cast %39 : vector<4x8xf32> to vector<4x8x1xf32>
      %41 = arith.addf %38, %40 : vector<4x8x1xf32>
      %c0_22 = arith.constant 0 : index
      %c0_23 = arith.constant 0 : index
      %c0_24 = arith.constant 0 : index
      %42 = vector.load %arg18[%c0_22, %c0_23, %c0_24] : memref<4x8x1xf32, #tpu.memory_space<vmem>>, vector<4x8x1xf32>
      tpu.vector_store %arg18[%c0_22, %c0_23, %c0_24], %41 {strides = array<i32>} : memref<4x8x1xf32, #tpu.memory_space<vmem>>, vector<4x8x1xf32>,
      %c0_25 = arith.constant 0 : index
      %c0_26 = arith.constant 0 : index
      %c0_27 = arith.constant 0 : index
      %43 = vector.load %arg19[%c0_25, %c0_26, %c0_27] : memref<4x8x8xf32, #tpu.memory_space<vmem>>, vector<4x8x8xf32>
      %44 = vector.broadcast %33 : vector<4x8x1xf32> to vector<4x8x8xf32>
      %45 = arith.mulf %44, %43 : vector<4x8x8xf32>
      "tpu.trace_start"() <{level = 10 : i32, message = "hts,hsd->htd"}> : () -> ()
      %cst_28 = arith.constant dense<0.000000e+00> : vector<4x8x8xf32>
      %46 = tpu.matmul %36, %17, %cst_28 {dimension_numbers = #tpu.dot_dimension_numbers<[2], [1], [1], [2], [0, 0, 0, 1, 1, 2], [0], [0]>} : vector<4x8x8xf32>, vector<4x8x8xf32>, vector<4x8x8xf32> -> vector<4x8x8xf32>
      "tpu.trace_stop"() : () -> ()
      %47 = arith.addf %45, %46 : vector<4x8x8xf32>
      %c0_29 = arith.constant 0 : index
      %c0_30 = arith.constant 0 : index
      %c0_31 = arith.constant 0 : index
      %48 = vector.load %arg19[%c0_29, %c0_30, %c0_31] : memref<4x8x8xf32, #tpu.memory_space<vmem>>, vector<4x8x8xf32>
      tpu.vector_store %arg19[%c0_29, %c0_30, %c0_31], %47 {strides = array<i32>} : memref<4x8x8xf32, #tpu.memory_space<vmem>>, vector<4x8x8xf32>,
      %c0_32 = arith.constant 0 : index
      %c0_33 = arith.constant 0 : index
      %c0_34 = arith.constant 0 : index
      %49 = vector.load %arg17[%c0_32, %c0_33, %c0_34] : memref<4x8x1xf32, #tpu.memory_space<vmem>>, vector<4x8x1xf32>
      tpu.vector_store %arg17[%c0_32, %c0_33, %c0_34], %31 {strides = array<i32>} : memref<4x8x1xf32, #tpu.memory_space<vmem>>, vector<4x8x1xf32>,
      %c0_35 = arith.constant 0 : index
      %c0_36 = arith.constant 0 : index
      %c0_37 = arith.constant 0 : index
      %50 = vector.load %arg18[%c0_35, %c0_36, %c0_37] : memref<4x8x1xf32, #tpu.memory_space<vmem>>, vector<4x8x1xf32>
      %51 = tpu.reciprocal %50 {approx = true} : vector<4x8x1xf32> -> vector<4x8x1xf32>
      %c0_38 = arith.constant 0 : index
      %c0_39 = arith.constant 0 : index
      %c0_40 = arith.constant 0 : index
      %52 = vector.load %arg19[%c0_38, %c0_39, %c0_40] : memref<4x8x8xf32, #tpu.memory_space<vmem>>, vector<4x8x8xf32>
      %53 = vector.broadcast %51 : vector<4x8x1xf32> to vector<4x8x8xf32>
      %54 = arith.mulf %52, %53 : vector<4x8x8xf32>
      %55 = tpu.transpose %54, [1, 0, 2] : vector<4x8x8xf32> -> vector<8x4x8xf32>
      %56 = vector.shape_cast %55 : vector<8x4x8xf32> to vector<8x32xf32>
      %c0_41 = arith.constant 0 : index
      %c0_42 = arith.constant 0 : index
      %57 = vector.load %arg11[%c0_41, %c0_42] : memref<32x32xf32, #tpu.memory_space<vmem>>, vector<32x32xf32>
      %cst_43 = arith.constant dense<0.000000e+00> : vector<8x32xf32>
      %58 = tpu.matmul %56, %57, %cst_43 {dimension_numbers = #tpu.dot_dimension_numbers<[1], [0], [0], [1], [0, 0, 1, 1], [], []>} : vector<8x32xf32>, vector<32x32xf32>, vector<8x32xf32> -> vector<8x32xf32>
      %c0_44 = arith.constant 0 : index
      %c0_45 = arith.constant 0 : index
      %59 = vector.load %arg12[%c0_44, %c0_45] : memref<1x32xf32, #tpu.memory_space<vmem>>, vector<1x32xf32>
      %60 = vector.broadcast %59 : vector<1x32xf32> to vector<8x32xf32>
      %61 = arith.addf %58, %60 : vector<8x32xf32>
      %c0_46 = arith.constant 0 : index
      %c0_47 = arith.constant 0 : index
      %c0_48 = arith.constant 0 : index
      %62 = vector.load %arg13[%c0_46, %c0_47, %c0_48] : memref<1x8x32xf32, #tpu.memory_space<vmem>>, vector<1x8x32xf32>
      %63 = vector.shape_cast %62 : vector<1x8x32xf32> to vector<8x32xf32>
      %64 = vector.shape_cast %61 : vector<8x32xf32> to vector<1x8x32xf32>
      tpu.vector_store %arg13[%c0_46, %c0_47, %c0_48], %64 {strides = array<i32>} : memref<1x8x32xf32, #tpu.memory_space<vmem>>, vector<1x8x32xf32>,
    } else {
    }
    return
  }
  func.func @transform_0(%arg0: i32, %arg1: i32, %arg2: i32) -> (i32, i32, i32) {
    %c0_i32 = arith.constant 0 : i32
    %c0_i32_0 = arith.constant 0 : i32
    return %arg0, %arg1, %c0_i32 : i32, i32, i32
  }
  func.func @transform_1(%arg0: i32, %arg1: i32, %arg2: i32) -> (i32, i32, i32) {
    %c0_i32 = arith.constant 0 : i32
    %0 = arith.cmpi eq, %arg1, %c0_i32 : i32
    %c0_i32_0 = arith.constant 0 : i32
    %1 = arith.select %0, %arg2, %c0_i32_0 : i32
    %c0_i32_1 = arith.constant 0 : i32
    %c0_i32_2 = arith.constant 0 : i32
    return %arg0, %1, %c0_i32_1 : i32, i32, i32
  }
  func.func @transform_2(%arg0: i32, %arg1: i32, %arg2: i32) -> (i32, i32) {
    %c0_i32 = arith.constant 0 : i32
    %c0_i32_0 = arith.constant 0 : i32
    %c0_i32_1 = arith.constant 0 : i32
    return %c0_i32, %c0_i32_0 : i32, i32
  }
  func.func @transform_3(%arg0: i32, %arg1: i32, %arg2: i32) -> (i32, i32) {
    %c0_i32 = arith.constant 0 : i32
    %c0_i32_0 = arith.constant 0 : i32
    %c0_i32_1 = arith.constant 0 : i32
    return %c0_i32, %c0_i32_0 : i32, i32
  }
  func.func @transform_4(%arg0: i32, %arg1: i32, %arg2: i32) -> (i32, i32) {
    %c0_i32 = arith.constant 0 : i32
    %c0_i32_0 = arith.constant 0 : i32
    %c0_i32_1 = arith.constant 0 : i32
    return %c0_i32, %c0_i32_0 : i32, i32
  }
  func.func @transform_5(%arg0: i32, %arg1: i32, %arg2: i32) -> (i32, i32) {
    %c0_i32 = arith.constant 0 : i32
    %c0_i32_0 = arith.constant 0 : i32
    %c0_i32_1 = arith.constant 0 : i32
    return %c0_i32, %c0_i32_0 : i32, i32
  }
  func.func @transform_6(%arg0: i32, %arg1: i32, %arg2: i32) -> (i32, i32) {
    %c0_i32 = arith.constant 0 : i32
    %c0_i32_0 = arith.constant 0 : i32
    %c0_i32_1 = arith.constant 0 : i32
    return %c0_i32, %c0_i32_0 : i32, i32
  }
  func.func @transform_7(%arg0: i32, %arg1: i32, %arg2: i32) -> (i32, i32) {
    %c0_i32 = arith.constant 0 : i32
    %c0_i32_0 = arith.constant 0 : i32
    %c0_i32_1 = arith.constant 0 : i32
    return %c0_i32, %c0_i32_0 : i32, i32
  }
  func.func @transform_8(%arg0: i32, %arg1: i32, %arg2: i32) -> (i32, i32) {
    %c0_i32 = arith.constant 0 : i32
    %c0_i32_0 = arith.constant 0 : i32
    %c0_i32_1 = arith.constant 0 : i32
    return %c0_i32, %c0_i32_0 : i32, i32
  }
  func.func @transform_9(%arg0: i32, %arg1: i32, %arg2: i32) -> (i32, i32) {
    %c0_i32 = arith.constant 0 : i32
    %c0_i32_0 = arith.constant 0 : i32
    %c0_i32_1 = arith.constant 0 : i32
    return %c0_i32, %c0_i32_0 : i32, i32
  }
  func.func @transform_10(%arg0: i32, %arg1: i32, %arg2: i32) -> (i32, i32, i32) {
    %c0_i32 = arith.constant 0 : i32
    %c0_i32_0 = arith.constant 0 : i32
    return %arg0, %arg1, %c0_i32 : i32, i32, i32
  }
}

</mosaic_0001>

<bundles_post_ra>
// kernel: tpu_custom_call.1
= control target key start
LH: loop header
LB: loop body
LE: loop exit
PB: predicated region body
PF: predicated region fallthrough
CT: control target
= control target key end

     0   :  { %s5199_s0 = inlined_call_operand.hbm [shape: f32[2,16,32], index: 0, kind: input, shape index: {}]   ;;  %s5200_s1 = inlined_call_operand.hbm [shape: f32[2,16,32], index: 1, kind: input, shape index: {}]   ;;  %s5201_s2 = inlined_call_operand.hbm [shape: f32[32,32], index: 2, kind: input, shape index: {}]   ;;  %s5202_s3 = inlined_call_operand.hbm [shape: f32[32,32], index: 3, kind: input, shape index: {}]   ;;  %s5203_s4 = inlined_call_operand.hbm [shape: f32[32,32], index: 4, kind: input, shape index: {}]   ;;  %s5204_s5 = inlined_call_operand.hbm [shape: f32[1,32], index: 5, kind: input, shape index: {}]   ;;  %s5205_s6 = inlined_call_operand.hbm [shape: f32[1,32], index: 6, kind: input, shape index: {}]   ;;  %s5206_s7 = inlined_call_operand.hbm [shape: f32[1,32], index: 7, kind: input, shape index: {}]   ;;  %s5207_s8 = inlined_call_operand.hbm [shape: f32[32,32], index: 8, kind: input, shape index: {}]   ;;  %s5208_s9 = inlined_call_operand.hbm [shape: f32[1,32], index: 9, kind: input, shape index: {}]   ;;  %s5209_s10 = inlined_call_operand.hbm [shape: f32[2,16,32], index: 10, kind: output, shape index: {}]  }
   0x1   :  { %5232 = sst [smem:[#allocation43_spill]] %s5199_s0 }
   0x2   :  { %5233 = sst [smem:[#allocation44_spill]] %s5200_s1 }
   0x3   :  { %5234 = sst [smem:[#allocation45_spill]] %s5201_s2 }
   0x4   :  { %5235 = sst [smem:[#allocation46_spill]] %s5202_s3 }
   0x5   :  { %5236 = sst [smem:[#allocation47_spill]] %s5203_s4 }
   0x6   :  { %5237 = sst [smem:[#allocation48_spill]] %s5204_s5 }
   0x7   :  { %5238 = sst [smem:[#allocation49_spill]] %s5205_s6 }
   0x8   :  { %5239 = sst [smem:[#allocation50_spill]] %s5206_s7 }
   0x9   :  { %5240 = sst [smem:[#allocation51_spill]] %s5207_s8 }
   0xa   :  { %5241 = sst [smem:[#allocation52_spill]] %s5208_s9 }
   0xb   :  { %5242 = sst [smem:[#allocation53_spill]] %s5209_s10 }
   0xc   :  { %15 = vsyncpa [#allocation9], 0 }
   0xd   :  { %17 = vsyncpa [#allocation9 + $0x1], 0 }
   0xe   :  { %18 = vsyncpa [#allocation12], 0 }
   0xf   :  { %20 = vsyncpa [#allocation12 + $0x1], 0 }
  0x10   :  { %21 = vsyncpa [#allocation15], 0 }
  0x11   :  { %22 = vsyncpa [#allocation18], 0 }
  0x12   :  { %23 = vsyncpa [#allocation21], 0 }
  0x13   :  { %24 = vsyncpa [#allocation24], 0 }
  0x14   :  { %25 = vsyncpa [#allocation10], 0 }
  0x15   :  { %27 = vsyncpa [#allocation10 + $0x1], 0  ;;  %s4397_s13 = smov 0   ;;  %s4399_s14 = smov 0  }
  0x16   :  { %s4401_s15 = smov 0   ;;  %s4403_s16 = smov 0  }
  0x17   :  { %s4405_s17 = smov 0   ;;  %s4407_s18 = smov 0  }
  0x18   :  { %s4409_s19 = smov 0   ;;  %s4411_s20 = smov 0  }
  0x19   :  { %s4413_s21 = smov 0   ;;  %s4415_s22 = smov 0  }
  0x1a   :  { %s4417_s23 = smov 0   ;;  %s4419_s24 = smov 0  }
  0x1b   :  { %s4421_s25 = smov 0  }
  0x1c LB: > { %5243 = sst [smem:[#allocation34_spill]] %s4250_s13  ;;  %s4463_s26 = sadd.s32 4294967295, %s4298_s25   ;;  %s4298_s25 = sphi %s4421_s25, %s33_s25   ;;  %s4294_s24 = sphi %s4419_s24, %s5325_s24   ;;  %s4290_s23 = sphi %s4417_s23, %s5324_s23   ;;  %s4286_s22 = sphi %s4415_s22, %s5323_s22   ;;  %s4282_s21 = sphi %s4413_s21, %s5322_s21   ;;  %s4278_s20 = sphi %s4411_s20, %s5321_s20   ;;  %s4274_s19 = sphi %s4409_s19, %s5320_s19   ;;  %s4270_s18 = sphi %s4407_s18, %s5319_s18   ;;  %s4266_s17 = sphi %s4405_s17, %s5318_s17   ;;  %s4262_s16 = sphi %s4403_s16, %s5317_s16   ;;  %s4258_s15 = sphi %s4401_s15, %s5316_s15   ;;  %s4254_s14 = sphi %s4399_s14, %s5313_s14   ;;  %s4250_s13 = sphi %s4397_s13, %s5312_s13  }
  0x1d   : > { %5244 = sst [smem:[#allocation35_spill]] %s4254_s14  ;;  %p3293_p0 = scmp.ge.s32.totalorder %s4298_s25, 1 }
  0x1e   : > { %5245 = sst [smem:[#allocation36_spill]] %s4258_s15  ;;  %p5222_p1 = scmp.eq.s32.totalorder %s4463_s26, 0 }
  0x1f   : > { %5246 = sst [smem:[#allocation37_spill]] %s4274_s19  ;;  %p313_p2 = scmp.lt.s32.totalorder %s4298_s25, 9 }
  0x20   : > { %5247 = sst [smem:[#allocation38_spill]] %s4278_s20  ;;  %s4300_s28 = smov [#allocation13]  }
  0x21   : > { %5248 = sst [smem:[#allocation39_spill]] %s4282_s21  ;;  %p4468_p3 = pnand %p3293_p0, %p313_p2 }
  0x22   : > { %5249 = sst [smem:[#allocation40_spill]] %s4463_s26  ;;  %s325_s29 = sshll.u32 %s4300_s28, 4  ;;  %s4472_s29 = int_to_ptr.vmem [resolvable:$true] %s325_s29 }
  0x23   : > { %s5250_s27 = scalar_select %p4468_p3, 1, 0 }
  0x24   : > { %p3611_p4 = pneg %p4468_p3  ;;  %s4301_s11 = smov [#allocation14]  }
  0x25   : > { %5251 = sst [smem:[#allocation41_spill]] %s5250_s27  ;;  %s338_s12 = sshll.u32 %s4301_s11, 4  ;;  %s4482_s12 = int_to_ptr.vmem [resolvable:$true] %s338_s12 }
  0x26   : > { %p4478_p5 = pnand %p3611_p4, %p5222_p1  ;;  %s4302_s10 = smov [#allocation17]  }
  0x27   : > { %s4484_s21 = sshll.u32 %s4302_s10, 4  ;;  %s5253_s2 = sld [smem:[#allocation45_spill]]  ;;  %s366_s21 = int_to_ptr.vmem [resolvable:$true] %s4484_s21 }
  0x28   : > { %p4494_p7 = pneg %p4478_p5 }
  0x2d   : > { %s3852_s28 = scalar_lea.hbm %s5253_s2, 512 }
  0x2e   : > { %p3853_p6 = scmp.ne.s32.totalorder %s5253_s2, %s3852_s28  ;;  %p3859_p10 = scmp.lt.u32.totalorder %s3852_s28, %s5253_s2 }
  0x30   : > { %p3855_p8 = pnand %p4494_p7, %p3853_p6 }
  0x32   : > { %p3856_p9 = pneg %p3855_p8 }
  0x34   : > { %p3861_p11 = pnand %p3859_p10, %p3856_p9 }
  0x36   : > { %3864 = shalt.err (!%p3861_p11)
}
  0x37   : > { %s3865_s1 = scalar_lea.vmem %s4472_s29, 512  ;;  %p3873_p2 = scmp.lt.s32.totalorder %s4472_s29, %s4472_s29 }
  0x38   : > { %p3866_p12 = scmp.ne.s32.totalorder %s4472_s29, %s3865_s1  ;;  %p3874_p4 = scmp.lt.s32.totalorder %s3865_s1, %s3865_s1 }
  0x3a   : > { %p3868_p13 = pnand %p3866_p12, %p4494_p7  ;;  %p3875_p6 = por %p3874_p4, %p3873_p2 }
  0x3c   : > { %p3869_p0 = pneg %p3868_p13 }
  0x3e   : > { %p3876_p8 = pnand %p3875_p6, %p3869_p0 }
  0x40   : > { %3879 = shalt.err (!%p3876_p8)
}
  0x41   : > { %s5224_s19 = smov 128   ;;  %s4304_s20 = smov 8  }
  0x42   : > { %3614 = dma.hbm_to_vmem [thread:$0]  (!%p4478_p5), %s5253_s2, 512, %s4472_s29, [#allocation12], %s5224_s19, %s5224_s19, %s4304_s20  }
  0x43   : > { %s5255_s3 = sld [smem:[#allocation46_spill]] }
  0x49   : > { %s3880_s1 = scalar_lea.hbm %s5255_s3, 512 }
  0x4a   : > { %p3881_p9 = scmp.ne.s32.totalorder %s5255_s3, %s3880_s1  ;;  %p3887_p12 = scmp.lt.u32.totalorder %s3880_s1, %s5255_s3 }
  0x4c   : > { %p3883_p10 = pnand %p3881_p9, %p4494_p7 }
  0x4e   : > { %p3884_p11 = pneg %p3883_p10 }
  0x50   : > { %p3889_p13 = pnand %p3887_p12, %p3884_p11 }
  0x52   : > { %3892 = shalt.err (!%p3889_p13)
}
  0x53   : > { %s3893_s29 = scalar_lea.vmem %s4482_s12, 512  ;;  %p3901_p6 = scmp.lt.s32.totalorder %s4482_s12, %s4482_s12 }
  0x54   : > { %p3894_p0 = scmp.ne.s32.totalorder %s4482_s12, %s3893_s29  ;;  %p3902_p8 = scmp.lt.s32.totalorder %s3893_s29, %s3893_s29 }
  0x56   : > { %p3896_p2 = pnand %p3894_p0, %p4494_p7  ;;  %p3903_p9 = por %p3902_p8, %p3901_p6 }
  0x58   : > { %p3897_p4 = pneg %p3896_p2 }
  0x5a   : > { %p3904_p10 = pnand %p3903_p9, %p3897_p4 }
  0x5c   : > { %3907 = shalt.err (!%p3904_p10)
}
  0x5d   : > { %3617 = dma.hbm_to_vmem [thread:$0]  (!%p4478_p5), %s5255_s3, 512, %s4482_s12, [#allocation15], %s5224_s19, %s5224_s19, %s4304_s20  }
  0x5e   : > { %s5256_s5 = sld [smem:[#allocation48_spill]] }
  0x64   : > { %s3908_s27 = scalar_lea.hbm %s5256_s5, 16 }
  0x65   : > { %p3909_p11 = scmp.ne.s32.totalorder %s5256_s5, %s3908_s27  ;;  %p3915_p0 = scmp.lt.u32.totalorder %s3908_s27, %s5256_s5 }
  0x67   : > { %p3911_p12 = pnand %p3909_p11, %p4494_p7 }
  0x69   : > { %p3912_p13 = pneg %p3911_p12 }
  0x6b   : > { %p3917_p2 = pnand %p3915_p0, %p3912_p13 }
  0x6d   : > { %3920 = shalt.err (!%p3917_p2)
}
  0x6e   : > { %s3921_s29 = scalar_lea.vmem %s366_s21, 16  ;;  %s3928_s12 = scalar_lea.vmem %s366_s21, 32 }
  0x6f   : > { %p3922_p4 = scmp.ne.s32.totalorder %s366_s21, %s3921_s29  ;;  %p3929_p9 = scmp.lt.s32.totalorder %s366_s21, %s366_s21 }
  0x70   : > { %p3930_p10 = scmp.lt.s32.totalorder %s3928_s12, %s3921_s29 }
  0x71   : > { %p3924_p6 = pnand %p3922_p4, %p4494_p7 }
  0x72   : > { %p3931_p1 = por %p3930_p10, %p3929_p9 }
  0x73   : > { %p3925_p8 = pneg %p3924_p6 }
  0x75   : > { %p3932_p3 = pnand %p3931_p1, %p3925_p8 }
  0x77   : > { %3935 = shalt.err (!%p3932_p3)
}
  0x78   : > { %3623 = dma.hbm_to_vmem [thread:$0]  (!%p4478_p5), %s5256_s5, 16, %s366_s21, [#allocation18]  }
  0x79   : > { %s4305_s15 = smov [#allocation20]   ;;  %s4306_s27 = smov [#allocation16]  }
  0x7a   : > { %s387_s26 = sshll.u32 %s4305_s15, 4  ;;  %s351_s28 = sshll.u32 %s4306_s27, 4  ;;  %s388_s26 = int_to_ptr.vmem [resolvable:$true] %s387_s26  ;;  %s352_s28 = int_to_ptr.vmem [resolvable:$true] %s351_s28 }
  0x7b   : > { %s5257_s7 = sld [smem:[#allocation50_spill]] }
  0x81   : > { %s3936_s1 = scalar_lea.hbm %s5257_s7, 16 }
  0x82   : > { %p3937_p1 = scmp.ne.s32.totalorder %s5257_s7, %s3936_s1  ;;  %p3943_p12 = scmp.lt.u32.totalorder %s3936_s1, %s5257_s7 }
  0x84   : > { %p3939_p3 = pnand %p3937_p1, %p4494_p7 }
  0x86   : > { %p3940_p11 = pneg %p3939_p3 }
  0x88   : > { %p3945_p13 = pnand %p3943_p12, %p3940_p11 }
  0x8a   : > { %3948 = shalt.err (!%p3945_p13)
}
  0x8b   : > { %s3949_s21 = scalar_lea.vmem %s388_s26, 16  ;;  %s3956_s14 = scalar_lea.vmem %s388_s26, 32 }
  0x8c   : > { %p3950_p0 = scmp.ne.s32.totalorder %s388_s26, %s3949_s21  ;;  %p3957_p6 = scmp.lt.s32.totalorder %s388_s26, %s388_s26 }
  0x8d   : > { %p3958_p8 = scmp.lt.s32.totalorder %s3956_s14, %s3949_s21 }
  0x8e   : > { %p3952_p2 = pnand %p3950_p0, %p4494_p7 }
  0x8f   : > { %p3959_p9 = por %p3958_p8, %p3957_p6 }
  0x90   : > { %p3953_p4 = pneg %p3952_p2 }
  0x92   : > { %p3960_p10 = pnand %p3959_p9, %p3953_p4 }
  0x94   : > { %3963 = shalt.err (!%p3960_p10)
}
  0x95   : > { %3629 = dma.hbm_to_vmem [thread:$0]  (!%p4478_p5), %s5257_s7, 16, %s388_s26, [#allocation21]  }
  0x96   : > { %s5258_s4 = sld [smem:[#allocation47_spill]] }
  0x9c   : > { %s3964_s10 = scalar_lea.hbm %s5258_s4, 512 }
  0x9d   : > { %p3965_p1 = scmp.ne.s32.totalorder %s5258_s4, %s3964_s10  ;;  %p3971_p12 = scmp.lt.u32.totalorder %s3964_s10, %s5258_s4 }
  0x9f   : > { %p3967_p3 = pnand %p3965_p1, %p4494_p7 }
  0xa1   : > { %p3968_p11 = pneg %p3967_p3 }
  0xa3   : > { %p3973_p13 = pnand %p3971_p12, %p3968_p11 }
  0xa5   : > { %3976 = shalt.err (!%p3973_p13)
}
  0xa6   : > { %s3977_s21 = scalar_lea.vmem %s352_s28, 512  ;;  %p3985_p6 = scmp.lt.s32.totalorder %s352_s28, %s352_s28 }
  0xa7   : > { %p3978_p0 = scmp.ne.s32.totalorder %s352_s28, %s3977_s21  ;;  %p3986_p8 = scmp.lt.s32.totalorder %s3977_s21, %s3977_s21 }
  0xa9   : > { %p3980_p2 = pnand %p3978_p0, %p4494_p7  ;;  %p3987_p9 = por %p3986_p8, %p3985_p6 }
  0xab   : > { %p3981_p4 = pneg %p3980_p2 }
  0xad   : > { %p3988_p10 = pnand %p3987_p9, %p3981_p4 }
  0xaf   : > { %3991 = shalt.err (!%p3988_p10)
}
  0xb0   : > { %s5259_s26 = smov 128   ;;  %s4307_s27 = smov [#allocation19]  }
  0xb1   : > { %3620 = dma.hbm_to_vmem [thread:$0]  (!%p4478_p5), %s5258_s4, 512, %s352_s28, [#allocation15], %s5259_s26, %s5259_s26, %s4304_s20  }
  0xb2   : > { %s376_s19 = sshll.u32 %s4307_s27, 4  ;;  %s4308_s11 = smov [#allocation22]   ;;  %s377_s19 = int_to_ptr.vmem [resolvable:$true] %s376_s19 }
  0xb3   : > { %s397_s10 = sshll.u32 %s4308_s11, 4  ;;  %s5260_s6 = sld [smem:[#allocation49_spill]]  ;;  %s398_s10 = int_to_ptr.vmem [resolvable:$true] %s397_s10 }
  0xb9   : > { %s3992_s12 = scalar_lea.hbm %s5260_s6, 16 }
  0xba   : > { %p3993_p1 = scmp.ne.s32.totalorder %s5260_s6, %s3992_s12  ;;  %p3999_p12 = scmp.lt.u32.totalorder %s3992_s12, %s5260_s6 }
  0xbc   : > { %p3995_p3 = pnand %p3993_p1, %p4494_p7 }
  0xbe   : > { %p3996_p11 = pneg %p3995_p3 }
  0xc0   : > { %p4001_p13 = pnand %p3999_p12, %p3996_p11 }
  0xc2   : > { %4004 = shalt.err (!%p4001_p13)
}
  0xc3   : > { %s4005_s28 = scalar_lea.vmem %s377_s19, 16  ;;  %s4012_s15 = scalar_lea.vmem %s377_s19, 32 }
  0xc4   : > { %p4006_p0 = scmp.ne.s32.totalorder %s377_s19, %s4005_s28  ;;  %p4013_p6 = scmp.lt.s32.totalorder %s377_s19, %s377_s19 }
  0xc5   : > { %p4014_p8 = scmp.lt.s32.totalorder %s4012_s15, %s4005_s28 }
  0xc6   : > { %p4008_p2 = pnand %p4006_p0, %p4494_p7 }
  0xc7   : > { %p4015_p9 = por %p4014_p8, %p4013_p6 }
  0xc8   : > { %p4009_p4 = pneg %p4008_p2 }
  0xca   : > { %p4016_p10 = pnand %p4015_p9, %p4009_p4 }
  0xcc   : > { %4019 = shalt.err (!%p4016_p10)
}
  0xcd   : > { %3626 = dma.hbm_to_vmem [thread:$0]  (!%p4478_p5), %s5260_s6, 16, %s377_s19, [#allocation18]  }
  0xce   : > { %s5261_s8 = sld [smem:[#allocation51_spill]] }
  0xd4   : > { %s4020_s29 = scalar_lea.hbm %s5261_s8, 512 }
  0xd5   : > { %p4021_p1 = scmp.ne.s32.totalorder %s5261_s8, %s4020_s29  ;;  %p4027_p12 = scmp.lt.u32.totalorder %s4020_s29, %s5261_s8 }
  0xd7   : > { %p4023_p3 = pnand %p4021_p1, %p4494_p7 }
  0xd9   : > { %p4024_p11 = pneg %p4023_p3 }
  0xdb   : > { %p4029_p13 = pnand %p4027_p12, %p4024_p11 }
  0xdd   : > { %4032 = shalt.err (!%p4029_p13)
}
  0xde   : > { %s4033_s28 = scalar_lea.vmem %s398_s10, 512  ;;  %p4041_p6 = scmp.lt.s32.totalorder %s398_s10, %s398_s10 }
  0xdf   : > { %p4034_p0 = scmp.ne.s32.totalorder %s398_s10, %s4033_s28  ;;  %p4042_p8 = scmp.lt.s32.totalorder %s4033_s28, %s4033_s28 }
  0xe1   : > { %p4036_p2 = pnand %p4034_p0, %p4494_p7  ;;  %p4043_p9 = por %p4042_p8, %p4041_p6 }
  0xe3   : > { %p4037_p4 = pneg %p4036_p2 }
  0xe5   : > { %p4044_p10 = pnand %p4043_p9, %p4037_p4 }
  0xe7   : > { %4047 = shalt.err (!%p4044_p10)
}
  0xe8   : > { %3632 = dma.hbm_to_vmem [thread:$0]  (!%p4478_p5), %s5261_s8, 512, %s398_s10, [#allocation21], %s5259_s26, %s5259_s26, %s4304_s20  }
  0xe9   : > { %s4309_s27 = smov [#allocation23]   ;;  %s5262_s9 = sld [smem:[#allocation52_spill]] }
  0xea   : > { %s411_s11 = sshll.u32 %s4309_s27, 4  ;;  %s412_s11 = int_to_ptr.vmem [resolvable:$true] %s411_s11 }
  0xef   : > { %s4048_s29 = scalar_lea.hbm %s5262_s9, 16 }
  0xf0   : > { %p4049_p1 = scmp.ne.s32.totalorder %s5262_s9, %s4048_s29  ;;  %p4055_p12 = scmp.lt.u32.totalorder %s4048_s29, %s5262_s9 }
  0xf2   : > { %p4051_p3 = pnand %p4049_p1, %p4494_p7 }
  0xf4   : > { %p4052_p11 = pneg %p4051_p3 }
  0xf6   : > { %p4057_p13 = pnand %p4055_p12, %p4052_p11 }
  0xf8   : > { %4060 = shalt.err (!%p4057_p13)
}
  0xf9   : > { %s4061_s20 = scalar_lea.vmem %s412_s11, 16  ;;  %s4068_s26 = scalar_lea.vmem %s412_s11, 32 }
  0xfa   : > { %p4062_p0 = scmp.ne.s32.totalorder %s412_s11, %s4061_s20  ;;  %p4069_p6 = scmp.lt.s32.totalorder %s412_s11, %s412_s11 }
  0xfb   : > { %p4070_p8 = scmp.lt.s32.totalorder %s4068_s26, %s4061_s20 }
  0xfc   : > { %p4064_p2 = pnand %p4062_p0, %p4494_p7 }
  0xfd   : > { %p4071_p9 = por %p4070_p8, %p4069_p6 }
  0xfe   : > { %p4065_p4 = pneg %p4064_p2 }
 0x100   : > { %p4072_p10 = pnand %p4071_p9, %p4065_p4 }
 0x102   : > { %4075 = shalt.err (!%p4072_p10)
}
 0x103   : > { %3635 = dma.hbm_to_vmem [thread:$0]  (!%p4478_p5), %s5262_s9, 16, %s412_s11, [#allocation24]  }
 0x104   : > { %s3292_s13 = sadd.s32 4294967294, %s4298_s25   ;;  %s45_s30 = sadd.s32 1, %s4286_s22 }
 0x105   : > { %s5263_s19 = sld [smem:[#allocation40_spill]]  ;;  %p46_p7 = scmp.ge.s32.totalorder %s45_s30, 2 }
 0x106   : > { %s48_s15 = sadd.s32 1, %s4290_s23  ;;  %s52_s27 = sadd.s32 1, %s4294_s24 }
 0x107   : > { %s61_s2 = sadd.s32 1, %s4270_s18  ;;  %s5327_s30 = smov (%p46_p7, %s45_s30), 0 }
 0x108   : > { %s5329_s15 = smov (!%p46_p7, %s48_s15), %s4290_s23  ;;  %p68_p1 = scmp.ne.s32.totalorder %s4270_s18, %s4266_s17 }
 0x109   : > { %p5227_p5 = scmp.eq.s32.totalorder %s4298_s25, 0  ;;  %p50_p3 = scmp.ge.s32.totalorder %s5329_s15, 2 }
 0x10a   : > { %p74_p11 = scmp.ne.s32.totalorder %s4266_s17, %s4262_s16  ;;  %p84_p13 = scmp.eq.s32.totalorder %s4290_s23, 0 }
 0x10b   : > { %p4677_p12 = por %p5227_p5, %p68_p1  ;;  %s5331_s15 = smov (%p50_p3, %s5329_s15), 0 }
 0x10c   : > { %s5333_s27 = smov (!%p50_p3, %s52_s27), %s4294_s24  ;;  %s57_s1 = ssub.s32 %s4290_s23, %s5331_s15 }
 0x10d   : > { %p5265_p0 = scmp.eq.s32.totalorder %s5263_s19, 0  ;;  %p54_p4 = scmp.ge.s32.totalorder %s5333_s27, 2 }
 0x10e   : > { %p86_p6 = scmp.eq.s32.totalorder %s5331_s15, 0  ;;  %p300_p8 = scmp.eq.s32.totalorder %s5263_s19, 7 }
 0x10f   : > { %p4692_p2 = por %p5265_p0, %p74_p11  ;;  %s5335_s27 = smov (%p54_p4, %s5333_s27), 0 }
 0x110   : > { %s85_s12 = scalar_select %p84_p13, %s4286_s22, 0 }
 0x111   : > { %5267 = sst [smem:[#allocation42_spill]] %s5335_s27  ;;  %s56_s21 = ssub.s32 %s4294_s24, %s5335_s27 }
 0x112   : > { %s87_s0 = scalar_select %p86_p6, %s5327_s30, 0 }
 0x113   : > { %s58_s14 = sor.u32 %s57_s1, %s56_s21  ;;  %p4710_p7 = por %p300_p8, %p68_p1 }
 0x114   : > { %s89_s20 = ssub.s32 %s85_s12, %s87_s0  ;;  %p59_p9 = scmp.eq.s32.totalorder %s58_s14, 0 }
 0x115   : > { %s4704_s26 = sor.u32 %s89_s20, %s56_s21  ;;  %p306_p3 = scmp.eq.s32.totalorder %s3292_s13, 7 }
 0x116   : > { %s5268_s10 = scalar_select %p4710_p7, 1, 0 }
 0x117   : > { %s4715_s28 = scalar_select %p59_p9, %s4270_s18, %s61_s2  }
 0x118   : > { %p5226_p13 = scmp.lt.s32.totalorder %s4298_s25, 8  ;;  %s422_s3 = sand.u32 1, %s4270_s18  }
 0x119   : > { %s3304_s1 = sshll.u32 %s4294_s24, 1  ;;  %p4725_p0 = por %p306_p3, %p74_p11 }
 0x11a   : > { %s3303_s21 = sshll.u32 %s422_s3, 3  ;;  %s431_s14 = sadd.s32 %s4290_s23, %s3304_s1 }
 0x11b   : > { %s5269_s0 = scalar_select %p4725_p0, 1, 0 }
 0x11c   : > { %s3305_s20 = sshll.u32 %s431_s14, 7  ;;  %s5270_s6 = sld [smem:[#allocation43_spill]] }
 0x11d   : > { %s426_s13 = scalar_lea.vmem [#allocation8], %s3303_s21  ;;  %p4741_p1 = pnand %p5226_p13, %p4677_p12 }
 0x11e   : > { %s435_s2 = sshll.u32 %s426_s13, 4  ;;  %s4745_s14 = sadd.s32 %s3304_s1, %s85_s12  ;;  %s4735_s2 = int_to_ptr.vmem [resolvable:$true] %s435_s2 }
 0x11f   : > { %s423_s4 = scalar_lea.sflag [#allocation9], %s422_s3  ;;  %p4078_p4 = pneg %p4741_p1 }
 0x122   : > { %s4733_s7 = scalar_lea.hbm %s5270_s6, %s3305_s20  ;;  %s4081_s20 = scalar_lea.hbm %s5270_s6, 512 }
 0x123   : > { %s4076_s5 = scalar_lea.hbm %s4733_s7, 128  ;;  %p4082_p12 = scmp.lt.u32.totalorder %s4733_s7, %s5270_s6 }
 0x124   : > { %p4077_p11 = scmp.ne.s32.totalorder %s4733_s7, %s4076_s5  ;;  %p4083_p9 = scmp.lt.u32.totalorder %s4081_s20, %s4076_s5 }
 0x125   : > { %p4085_p13 = scmp.lt.u32.totalorder %s4076_s5, %s4733_s7 }
 0x126   : > { %p4079_p6 = pnand %p4078_p4, %p4077_p11  ;;  %p4084_p3 = por %p4083_p9, %p4082_p12 }
 0x128   : > { %p4080_p8 = pneg %p4079_p6  ;;  %p4086_p5 = por %p4085_p13, %p4084_p3 }
 0x12a   : > { %p4087_p10 = pnand %p4086_p5, %p4080_p8 }
 0x12c   : > { %4090 = shalt.err (!%p4087_p10)
}
 0x12d   : > { %s4091_s3 = scalar_lea.vmem %s4735_s2, 128  ;;  %s4310_s12 = smov [#allocation8]  }
 0x12e   : > { %p4092_p11 = scmp.ne.s32.totalorder %s4735_s2, %s4091_s3  ;;  %s4096_s1 = sshll.u32 %s4310_s12, 4  ;;  %s4097_s1 = int_to_ptr.vmem [resolvable:$false] %s4096_s1 }
 0x12f   : > { %s4098_s9 = scalar_lea.vmem %s4097_s1, 256  ;;  %p4099_p7 = scmp.lt.s32.totalorder %s4735_s2, %s4097_s1 }
 0x130   : > { %p4094_p6 = pnand %p4092_p11, %p4078_p4  ;;  %p4100_p12 = scmp.lt.s32.totalorder %s4098_s9, %s4091_s3 }
 0x132   : > { %p4095_p0 = pneg %p4094_p6  ;;  %p4101_p9 = por %p4100_p12, %p4099_p7 }
 0x134   : > { %p4102_p13 = pnand %p4101_p9, %p4095_p0 }
 0x136   : > { %4105 = shalt.err (!%p4102_p13)
}
 0x137   : > { %s5272_s5 = sld [smem:[#allocation36_spill]]  ;;  %s5273_s21 = sld [smem:[#allocation35_spill]] }
 0x138   : > { %s5274_s11 = sld [smem:[#allocation34_spill]]  ;;  %p5275_p10 = scmp.eq.s32.totalorder %s4704_s26, 0 }
 0x139   : > { %3639 = dma.hbm_to_vmem [thread:$0]  (!%p4741_p1), %s4733_s7, 128, %s4735_s2, %s423_s4  }
 0x13a   : > { %p5276_p7 = scmp.eq.s32.totalorder %s4298_s25, 0  ;;  %s442_s13 = sand.u32 1, %s4298_s25  }
 0x13b   : > { %p5277_p8 = scmp.eq.s32.totalorder %s5263_s19, 0  ;;  %s3308_s9 = sshll.u32 %s4745_s14, 7 }
 0x13c   : > { %s5279_s7 = sld [smem:[#allocation44_spill]]  ;;  %p5280_p1 = scmp.lt.s32.totalorder %s4298_s25, 8 }
 0x13d   : > { %s93_s20 = sadd.s32 1, %s5272_s5  ;;  %p100_p5 = scmp.ne.s32.totalorder %s5272_s5, %s5273_s21 }
 0x13e   : > { %s4778_s8 = scalar_select %p5275_p10, %s5272_s5, %s93_s20  }
 0x13f   : > { %p102_p0 = por %p100_p5, %p5276_p7  ;;  %p106_p4 = scmp.ne.s32.totalorder %s5273_s21, %s5274_s11 }
 0x140   : > { %s444_s3 = sand.u32 1, %s5272_s5   ;;  %s443_s14 = scalar_lea.sflag [#allocation12], %s442_s13 }
 0x141   : > { %p4788_p3 = por %p106_p4, %p5277_p8  ;;  %s3306_s1 = sshll.u32 %s444_s3, 3 }
 0x142   : > { %s4796_s2 = scalar_lea.hbm %s5279_s7, %s3308_s9  ;;  %s446_s26 = scalar_lea.vmem [#allocation11], %s3306_s1 }
 0x143   : > { %s5278_s12 = scalar_select %p4788_p3, 1, 0 }
 0x144   : > { %s457_s4 = sshll.u32 %s446_s26, 4  ;;  %p4800_p11 = pnand %p5280_p1, %p102_p0  ;;  %s4804_s4 = int_to_ptr.vmem [resolvable:$true] %s457_s4 }
 0x145   : > { %s4106_s5 = scalar_lea.hbm %s4796_s2, 128  ;;  %s4111_s21 = scalar_lea.hbm %s5279_s7, 512 }
 0x146   : > { %p4107_p6 = scmp.ne.s32.totalorder %s4796_s2, %s4106_s5  ;;  %p4108_p12 = pneg %p4800_p11 }
 0x147   : > { %p4112_p5 = scmp.lt.u32.totalorder %s4796_s2, %s5279_s7  ;;  %p4113_p10 = scmp.lt.u32.totalorder %s4111_s21, %s4106_s5 }
 0x148   : > { %p4109_p9 = pnand %p4108_p12, %p4107_p6  ;;  %p4115_p0 = scmp.lt.u32.totalorder %s4106_s5, %s4796_s2 }
 0x149   : > { %p4114_p7 = por %p4113_p10, %p4112_p5 }
 0x14a   : > { %p4110_p13 = pneg %p4109_p9 }
 0x14b   : > { %p4116_p4 = por %p4115_p0, %p4114_p7 }
 0x14d   : > { %p4117_p8 = pnand %p4116_p4, %p4110_p13 }
 0x14f   : > { %4120 = shalt.err (!%p4117_p8)
}
 0x150   : > { %s4121_s13 = scalar_lea.vmem %s4804_s4, 128  ;;  %s4311_s3 = smov [#allocation11]  }
 0x151   : > { %p4122_p1 = scmp.ne.s32.totalorder %s4804_s4, %s4121_s13  ;;  %s4126_s1 = sshll.u32 %s4311_s3, 4  ;;  %s4127_s1 = int_to_ptr.vmem [resolvable:$false] %s4126_s1 }
 0x152   : > { %s4128_s9 = scalar_lea.vmem %s4127_s1, 256  ;;  %p4129_p3 = scmp.lt.s32.totalorder %s4804_s4, %s4127_s1 }
 0x153   : > { %p4124_p6 = pnand %p4122_p1, %p4108_p12  ;;  %p4130_p5 = scmp.lt.s32.totalorder %s4128_s9, %s4121_s13 }
 0x155   : > { %p4125_p9 = pneg %p4124_p6  ;;  %p4131_p10 = por %p4130_p5, %p4129_p3 }
 0x157   : > { %p4132_p7 = pnand %p4131_p10, %p4125_p9 }
 0x159   : > { %4135 = shalt.err (!%p4132_p7)
}
 0x15a   : > { %3642 = dma.hbm_to_vmem [thread:$0]  (!%p4800_p11), %s4796_s2, 128, %s4804_s4, %s443_s14  }
 0x15b   : > { %s5282_s26 = sld [smem:[#allocation41_spill]] }
 0x161   : > { %p5283_p13 = scmp.ne.s32.totalorder %s5282_s26, 0 }
 0x162   : > { %s4834_s5 = sand.u32 (!%p5283_p13), 1, %s4266_s17  }
 0x163   : > { %466 = sbr.rel (%p5283_p13) target bundleno = 3085 (0xc0d), region = 60  ;;  %s3310_s6 = sshll.u32 (!%p5283_p13), %s4834_s5, 3 }
 0x164   : > { %s469_s27 = scalar_lea.sflag (!%p5283_p13), [#allocation9], %s4834_s5  ;;  %s4838_s21 = scalar_lea.vmem (!%p5283_p13), [#allocation8], %s3310_s6 }
 0x16a   : > { %4217 = dma.done.wait (%p4692_p2), %s469_s27, 128  }
 0x16b   : > { %4219 = vsyncadd (%p4692_p2), %s469_s27, 4294967168  ;;  %s5284_s19 = sld [smem:[#allocation40_spill]]  ;;  %s5285_s2 = sld [smem:[#allocation35_spill]] }
 0x16c   : > { %p5286_p3 = scmp.ne.s32.totalorder %s5278_s12, 0 }
 0x171   : > { %s477_s4 = sand.u32 1, %s5284_s19   ;;  %s479_s14 = sand.u32 1, %s5285_s2  }
 0x172   : > { %s4846_s11 = sshll.u32 %s479_s14, 3  ;;  %s478_s20 = scalar_lea.sflag [#allocation12], %s477_s4 }
 0x173   : > { %s481_s13 = scalar_lea.vmem [#allocation11], %s4846_s11 }
 0x174   : > { %4221 = dma.done.wait (%p5286_p3), %s478_s20, 128  }
 0x175   : > { %4223 = vsyncadd (%p5286_p3), %s478_s20, 4294967168  ;;  %p5287_p11 = scmp.eq.s32.totalorder %s5284_s19, 0 }
 0x177   : > { %4225 = dma.done.wait (%p5287_p11), [#allocation12], 512   ;;  %p5288_p2 = pmov %p5287_p11 }
 0x179   : > { %4227 = vsyncadd (%p5288_p2), [#allocation12], 4294966784  ;;  %p5289_p12 = pmov %p5288_p2 }
 0x17a   : > { %p5290_p0 = pmov %p5288_p2 }
 0x17b   : > { %4229 = dma.done.wait (%p5289_p12), [#allocation15], 1024  }
 0x17c   : > { %4231 = vsyncadd (%p5290_p0), [#allocation15], 4294966272  ;;  %p5291_p4 = pmov %p5290_p0 }
 0x17d   : > { %p5292_p8 = pmov %p5290_p0 }
 0x17e   : > { %4233 = dma.done.wait (%p5291_p4), [#allocation18], 32  }
 0x17f   : > { %4235 = vsyncadd (%p5292_p8), [#allocation18], 4294967264  ;;  %p5293_p1 = pmov %p5290_p0 }
 0x180   : > { %p5294_p6 = pmov %p5290_p0 }
 0x181   : > { %4237 = dma.done.wait (%p5293_p1), [#allocation21], 528  }
 0x182   : > { %4239 = vsyncadd (%p5294_p6), [#allocation21], 4294966768  ;;  %p5295_p9 = pmov %p5290_p0 }
 0x183   : > { %p5296_p5 = pmov %p5290_p0 }
 0x184   : > { %4241 = dma.done.wait (%p5295_p9), [#allocation24], 16  }
 0x185   : > { %4243 = vsyncadd (%p5296_p5), [#allocation24], 4294967280  ;;  %s4873_s29 = scalar_lea.vmem [#allocation25], %s3310_s6  ;;  %s5297_s12 = sld [smem:[#allocation38_spill]] }
 0x18b   : > { %p3321_p10 = scmp.ne.s32.totalorder %s5297_s12, 0 }
 0x18c   : > { %v562_v0 = vld [vmem:[#allocation14] sm:$0xff] (!%p3321_p10)  ;;  %v563_v1 = vld [vmem:[#allocation14 + $0x8] sm:$0xff] (!%p3321_p10)  ;;  %v4312_v3 = vmov (!%p3321_p10), 0.0|0.0   ;;  %v564_v6 = vld [vmem:[#allocation14 + $0x10] sm:$0xff] (!%p3321_p10)  ;;  %vm4313_vm0 = vmmov (!%p3321_p10), 0   ;;  %v4314_v9 = vmov (!%p3321_p10), 0.0   ;;  %v743_v25 = vlaneseq (!%p3321_p10) }
 0x18d   : > { %560 = sbr.rel (%p3321_p10) target bundleno = 764 (0x2fc), region = 104  ;;  %v647_v2 = vld [vmem:[#allocation16] sm:$0xff] (!%p3321_p10)  ;;  %3549 = vmatprep.subr.bf16.mxu0 (!%p3321_p10), %v4312_v3  ;;  %v3550_v4 = vpack.c.bf16 (!%p3321_p10), %v563_v1, %v562_v0  ;;  %3555 = vmatprep.subr.bf16.mxu1 (!%p3321_p10), %v4312_v3  ;;  %v648_v5 = vld [vmem:[#allocation16 + $0x8] sm:$0xff] (!%p3321_p10)  ;;  %v565_v7 = vld [vmem:[#allocation14 + $0x18] sm:$0xff] (!%p3321_p10)  ;;  %vm573_vm1 = vcmask (!%p3321_p10), 261120   ;;  %s4315_s3 = smov (!%p3321_p10), 104  }
 0x18e   : > { %v3556_v8 = vpack.c.bf16 (!%p3321_p10), %v648_v5, %v647_v2  ;;  %3433 = vmatprep.mubr.msk.f32.mxu0 (!%p3321_p10), %vm4313_vm0, %v4314_v9  ;;  %v649_v10 = vld [vmem:[#allocation16 + $0x10] sm:$0xff] (!%p3321_p10)  ;;  %v650_v11 = vld [vmem:[#allocation16 + $0x18] sm:$0xff] (!%p3321_p10)  ;;  %3444 = vmatprep.mubr.msk.f32.mxu1 (!%p3321_p10), %vm4313_vm0, %v4314_v9  ;;  %v3553_v12 = vpack.c.bf16 (!%p3321_p10), %v565_v7, %v564_v6  ;;  %v3322_v15 = vld [vmem:[#allocation19] ss:$0 sm:$0xff] (!%p3321_p10)  ;;  %s4316_s1 = smov (!%p3321_p10), 120   ;;  %s4317_s9 = smov (!%p3321_p10), 112  }
 0x18f   : > { %3551 = vmatpush3.bf16.msra.mxu0 (!%p3321_p10), %v3550_v4  ;;  %v3559_v13 = vpack.c.bf16 (!%p3321_p10), %v650_v11, %v649_v10  ;;  %v561_v14 = vld [vmem:[%s481_s13] sm:$0xff] (!%p3321_p10)  ;;  %v3324_v17 = vld [vmem:[#allocation20] ss:$0 sm:$0xff] (!%p3321_p10)  ;;  %v4318_v23 = vmov (!%p3321_p10), 1983009808   ;;  %v744_v29 = vshrl.u32 (!%p3321_p10), %v743_v25, 7 }
 0x190   : > { %3552 = vmatprep.subr.bf16.mxu0 (!%p3321_p10), %v4312_v3  ;;  %3557 = vmatpush3.bf16.msra.mxu1 (!%p3321_p10), %v3556_v8  ;;  %v741_v24 = vunpack.c.l.s4 (!%p3321_p10), %v4318_v23  ;;  %v4319_v26 = vmov (!%p3321_p10), 1934713408   ;;  %vm876_vm2 = vcmask (!%p3321_p10), 64512   ;;  %s5298_s26 = sld [smem:[#allocation37_spill]] (!%p3321_p10) }
 0x191   : > { %3558 = vmatprep.subr.bf16.mxu1 (!%p3321_p10), %v4312_v3  ;;  %v773_v27 = vunpack.c.l.s4 (!%p3321_p10), %v4319_v26 }
 0x192   : > { %v742_v28 = vunpack.c.0.s8 (!%p3321_p10), %v741_v24 }
 0x193   : > { %3554 = vmatpush3.bf16.msra.mxu0 (!%p3321_p10), %v3553_v12  ;;  %v774_v32 = vunpack.c.0.s8 (!%p3321_p10), %v773_v27 }
 0x194   : > { %3560 = vmatpush3.bf16.msra.mxu1 %v3559_v13  ;;  %v4878_v33 = vsub.s32 %v742_v28, %v744_v29 }
 0x195   : > { %v4880_v40 = vsub.s32 %v774_v32, %v744_v29 }
 0x196   : > { %3434 = vmatmul.mubr.msk.f32.vlgmr.msra.gmra.mrb[0].mxu0 %vm573_vm1, %v561_v14  ;;  %s3328_s6 = sshll.u32 %s5298_s26, 5 }
 0x197   : > { %3445 = vmatmul.mubr.msk.f32.vlgmr.msra.gmra.mrb[0].mxu1 %vm573_vm1, %v561_v14  ;;  %s875_s27 = scalar_lea.vmem [#allocation3], %s3328_s6  ;;  %s1027_s19 = scalar_lea.vmem [#allocation4], %s3328_s6 }
 0x269   : > { %v643_v16 = vpop.f32.mrb[0].mxu0 }
 0x26a   : > { %v644_v18 = vadd.f32 %v3322_v15, %v643_v16  ;;  %v3435_v19 = vpop.f32.mrb[1].mxu0  ;;  %v724_v20 = vpop.f32.mrb[0].mxu1 }
 0x26b   : > { %v3446_v21 = vpop.f32.mrb[1].mxu1  ;;  %v725_v22 = vadd.f32 %v3324_v17, %v724_v20 }
 0x26c   : > { %735 = vrot.lane.b32.xlu1 %v644_v18, %s4315_s3  ;;  %729 = vrot.lane.b32.xlu0 %v644_v18, %s4316_s1 }
 0x270   : > { %882 = vrot.lane.b32.xlu1 %v725_v22, %s4316_s1  ;;  %732 = vrot.lane.b32.xlu0 %v644_v18, %s4317_s9 }
 0x274   : > { %888 = vrot.lane.b32.xlu1 %v725_v22, %s4315_s3  ;;  %885 = vrot.lane.b32.xlu0 %v725_v22, %s4317_s9 }
 0x2de   : > { %v736_v30 = vpop.permute.xlu1 %735  ;;  %v730_v31 = vpop.permute.xlu0 %729 }
 0x2df   : > { %v754_v34 = vcombine.low %v730_v31, %v736_v30  ;;  %v755_v35 = vcombine.high %v730_v31, %v736_v30 }
 0x2e1   : > { %v762_v41 = vrot.slane %v754_v34, %v4878_v33  ;;  %v769_v42 = vrot.slane %v755_v35, %v4878_v33 }
 0x2e2   : > { %v883_v36 = vpop.permute.xlu1 %882  ;;  %v733_v37 = vpop.permute.xlu0 %732 }
 0x2e3   : > { %v738_v38 = vcombine.low %v644_v18, %v733_v37  ;;  %v739_v39 = vcombine.high %v644_v18, %v733_v37 }
 0x2e5   : > { %v746_v43 = vrot.slane %v738_v38, %v4878_v33  ;;  %v753_v44 = vrot.slane %v739_v39, %v4878_v33 }
 0x2e6   : > { %v889_v45 = vpop.permute.xlu1 %888  ;;  %v886_v46 = vpop.permute.xlu0 %885 }
 0x2e7   : > { %v770_v47 = vcombine.low %v746_v43, %v762_v41  ;;  %v771_v48 = vcombine.high %v746_v43, %v762_v41  ;;  %v786_v49 = vcombine.low %v753_v44, %v769_v42  ;;  %v787_v50 = vcombine.high %v753_v44, %v769_v42 }
 0x2e8   : > { %v907_v51 = vcombine.low %v883_v36, %v889_v45  ;;  %v908_v52 = vcombine.high %v883_v36, %v889_v45  ;;  %v891_v53 = vcombine.low %v725_v22, %v886_v46  ;;  %v892_v54 = vcombine.high %v725_v22, %v886_v46 }
 0x2e9   : > { %v778_v55 = vrot.slane %v770_v47, %v4880_v40  ;;  %v785_v56 = vrot.slane %v771_v48, %v4880_v40  ;;  %v794_v57 = vrot.slane %v786_v49, %v4880_v40  ;;  %v801_v58 = vrot.slane %v787_v50, %v4880_v40 }
 0x2ea   : > { %v915_v59 = vrot.slane %v907_v51, %v4878_v33  ;;  %v922_v60 = vrot.slane %v908_v52, %v4878_v33  ;;  %v899_v61 = vrot.slane %v891_v53, %v4878_v33  ;;  %v906_v62 = vrot.slane %v892_v54, %v4878_v33 }
 0x2eb   : > { %v806_v63 = vcombine.low %v778_v55, %v785_v56  ;;  %v3326_v0 = vcombine.high %v778_v55, %v785_v56  ;;  %v822_v1 = vcombine.low %v794_v57, %v801_v58  ;;  %v3327_v2 = vcombine.high %v794_v57, %v801_v58 }
 0x2ec   : > { %v923_v3 = vcombine.low %v899_v61, %v915_v59  ;;  %v924_v4 = vcombine.high %v899_v61, %v915_v59  ;;  %v939_v5 = vcombine.low %v906_v62, %v922_v60  ;;  %v940_v6 = vcombine.high %v906_v62, %v922_v60 }
 0x2ed   : > { %v813_v7 = vrot.slane %v806_v63, %v4878_v33  ;;  %v821_v8 = vrot.slane %v3326_v0, %v4878_v33  ;;  %v829_v9 = vrot.slane %v822_v1, %v4878_v33  ;;  %v837_v10 = vrot.slane %v3327_v2, %v4878_v33 }
 0x2ee   : > { %v931_v11 = vrot.slane %v923_v3, %v4880_v40  ;;  %v938_v12 = vrot.slane %v924_v4, %v4880_v40  ;;  %v947_v13 = vrot.slane %v939_v5, %v4880_v40  ;;  %v954_v14 = vrot.slane %v940_v6, %v4880_v40 }
 0x2ef   : > { %v838_v15 = vcombine.low %v813_v7, %v821_v8  ;;  %v839_v16 = vcombine.high %v813_v7, %v821_v8  ;;  %v854_v17 = vcombine.low %v829_v9, %v837_v10  ;;  %v855_v18 = vcombine.high %v829_v9, %v837_v10 }
 0x2f0   : > { %v959_v19 = vcombine.low %v931_v11, %v938_v12  ;;  %v3329_v20 = vcombine.high %v931_v11, %v938_v12  ;;  %v975_v21 = vcombine.low %v947_v13, %v954_v14  ;;  %v3330_v22 = vcombine.high %v947_v13, %v954_v14 }
 0x2f1   : > { %v846_v23 = vrot.slane %v838_v15, %v4880_v40  ;;  %v853_v24 = vrot.slane %v839_v16, %v4880_v40  ;;  %v862_v25 = vrot.slane %v854_v17, %v4880_v40  ;;  %v869_v26 = vrot.slane %v855_v18, %v4880_v40 }
 0x2f2   : > { %v966_v27 = vrot.slane %v959_v19, %v4878_v33  ;;  %v974_v28 = vrot.slane %v3329_v20, %v4878_v33  ;;  %v982_v29 = vrot.slane %v975_v21, %v4878_v33  ;;  %v990_v30 = vrot.slane %v3330_v22, %v4878_v33 }
 0x2f3   : > { %v870_v31 = vcombine.low %v846_v23, %v862_v25  ;;  %v871_v32 = vcombine.high %v846_v23, %v862_v25  ;;  %v872_v34 = vcombine.low %v853_v24, %v869_v26  ;;  %v873_v35 = vcombine.high %v853_v24, %v869_v26 }
 0x2f4   : > { %v991_v36 = vcombine.low %v966_v27, %v974_v28  ;;  %v992_v37 = vcombine.high %v966_v27, %v974_v28  ;;  %v1007_v38 = vcombine.low %v982_v29, %v990_v30  ;;  %v1008_v39 = vcombine.high %v982_v29, %v990_v30 }
 0x2f5   : > { %877 = vst.msk [vmem:[%s875_s27] sm:$0xff] %vm876_vm2, %v870_v31  ;;  %878 = vst.msk [vmem:[%s875_s27 + $0x8] sm:$0xff] %vm876_vm2, %v871_v32 }
 0x2f6   : > { %879 = vst.msk [vmem:[%s875_s27 + $0x10] sm:$0xff] %vm876_vm2, %v872_v34  ;;  %880 = vst.msk [vmem:[%s875_s27 + $0x18] sm:$0xff] %vm876_vm2, %v873_v35  ;;  %v999_v33 = vrot.slane %v991_v36, %v4880_v40  ;;  %v1006_v41 = vrot.slane %v992_v37, %v4880_v40  ;;  %v1015_v42 = vrot.slane %v1007_v38, %v4880_v40 }
 0x2f7   : > { %v1022_v43 = vrot.slane %v1008_v39, %v4880_v40 }
 0x2f8   : > { %v1023_v44 = vcombine.low %v999_v33, %v1015_v42  ;;  %v1024_v45 = vcombine.high %v999_v33, %v1015_v42 }
 0x2f9   : > { %v1025_v46 = vcombine.low %v1006_v41, %v1022_v43  ;;  %v1026_v47 = vcombine.high %v1006_v41, %v1022_v43 }
 0x2fa   : > { %1028 = vst.msk [vmem:[%s1027_s19] sm:$0xff] %vm876_vm2, %v1023_v44  ;;  %1029 = vst.msk [vmem:[%s1027_s19 + $0x8] sm:$0xff] %vm876_vm2, %v1024_v45 }
 0x2fb   : > { %1030 = vst.msk [vmem:[%s1027_s19 + $0x10] sm:$0xff] %vm876_vm2, %v1025_v46  ;;  %1031 = vst.msk [vmem:[%s1027_s19 + $0x18] sm:$0xff] %vm876_vm2, %v1026_v47 }
 0x2fc PF: > { %s5299_s2 = sld [smem:[#allocation37_spill]] }
 0x302   : > { %p3331_p7 = scmp.ne.s32.totalorder %s5299_s2, 0 }
 0x303   : > { %v1037_v48 = vld [vmem:[#allocation13] sm:$0xff] (!%p3331_p7)  ;;  %v1038_v40 = vld [vmem:[#allocation13 + $0x8] sm:$0xff] (!%p3331_p7)  ;;  %v1039_v49 = vld [vmem:[#allocation13 + $0x10] sm:$0xff] (!%p3331_p7)  ;;  %v4320_v50 = vmov (!%p3331_p7), 0.0|0.0   ;;  %vm4321_vm3 = vmmov (!%p3331_p7), 0   ;;  %v4322_v53 = vmov (!%p3331_p7), 0.0   ;;  %v1138_v0 = vlaneseq (!%p3331_p7) }
 0x304   : > { %1035 = sbr.rel (%p3331_p7) target bundleno = 1136 (0x470), region = 108  ;;  %3561 = vmatprep.subr.bf16.mxu0 (!%p3331_p7), %v4320_v50  ;;  %v3562_v51 = vpack.c.bf16 (!%p3331_p7), %v1038_v40, %v1037_v48  ;;  %v1040_v52 = vld [vmem:[#allocation13 + $0x18] sm:$0xff] (!%p3331_p7)  ;;  %3455 = vmatprep.mubr.msk.f32.mxu0 (!%p3331_p7), %vm4321_vm3, %v4322_v53  ;;  %vm1274_vm4 = vcmask (!%p3331_p7), 7168   ;;  %v4323_v54 = vmov (!%p3331_p7), -1e+30   ;;  %v1036_v56 = vld [vmem:[%s4838_s21] sm:$0xff] (!%p3331_p7) }
 0x305   : > { %1275 = vst.msk [vmem:[#allocation5] sm:$0xff] (!%p3331_p7), %vm1274_vm4, %v4323_v54  ;;  %1276 = vst.msk [vmem:[#allocation5 + $0x8] sm:$0xff] (!%p3331_p7), %vm1274_vm4, %v4323_v54  ;;  %v3565_v55 = vpack.c.bf16 (!%p3331_p7), %v1040_v52, %v1039_v49  ;;  %vm1048_vm5 = vcmask (!%p3331_p7), 261120   ;;  %vm1269_vm6 = vcmask (!%p3331_p7), 64512   ;;  %v3332_v57 = vld [vmem:[#allocation17] ss:$0 sm:$0xff] (!%p3331_p7) }
 0x306   : > { %1277 = vst.msk [vmem:[#allocation5 + $0x10] sm:$0xff] (!%p3331_p7), %vm1274_vm4, %v4323_v54  ;;  %1278 = vst.msk [vmem:[#allocation5 + $0x18] sm:$0xff] (!%p3331_p7), %vm1274_vm4, %v4323_v54  ;;  %3563 = vmatpush3.bf16.msra.mxu0 (!%p3331_p7), %v3562_v51  ;;  %s4324_s4 = smov (!%p3331_p7), 104   ;;  %s4325_s14 = smov (!%p3331_p7), 120   ;;  %v4327_v62 = vmov (!%p3331_p7), 1983009808  }
 0x307   : > { %1279 = vst.msk [vmem:[#allocation6] sm:$0xff] (!%p3331_p7), %vm1274_vm4, %v4322_v53  ;;  %1280 = vst.msk [vmem:[#allocation6 + $0x8] sm:$0xff] (!%p3331_p7), %vm1274_vm4, %v4322_v53  ;;  %3564 = vmatprep.subr.bf16.mxu0 (!%p3331_p7), %v4320_v50  ;;  %s4326_s21 = smov (!%p3331_p7), 112   ;;  %v1136_v63 = vunpack.c.l.s4 (!%p3331_p7), %v4327_v62  ;;  %v4328_v1 = vmov (!%p3331_p7), 1934713408   ;;  %v1139_v4 = vshrl.u32 (!%p3331_p7), %v1138_v0, 7 }
 0x308   : > { %1281 = vst.msk [vmem:[#allocation6 + $0x10] sm:$0xff] (!%p3331_p7), %vm1274_vm4, %v4322_v53  ;;  %1282 = vst.msk [vmem:[#allocation6 + $0x18] sm:$0xff] (!%p3331_p7), %vm1274_vm4, %v4322_v53  ;;  %v1168_v2 = vunpack.c.l.s4 (!%p3331_p7), %v4328_v1 }
 0x309   : > { %1283 = vst.msk [vmem:[#allocation7] sm:$0xff] (!%p3331_p7), %vm1269_vm6, %v4322_v53  ;;  %1284 = vst.msk [vmem:[#allocation7 + $0x8] sm:$0xff] (!%p3331_p7), %vm1269_vm6, %v4322_v53  ;;  %v1137_v3 = vunpack.c.0.s8 (!%p3331_p7), %v1136_v63 }
 0x30a   : > { %3566 = vmatpush3.bf16.msra.mxu0 (!%p3331_p7), %v3565_v55  ;;  %1285 = vst.msk [vmem:[#allocation7 + $0x10] sm:$0xff] (!%p3331_p7), %vm1269_vm6, %v4322_v53  ;;  %1286 = vst.msk [vmem:[#allocation7 + $0x18] sm:$0xff] (!%p3331_p7), %vm1269_vm6, %v4322_v53  ;;  %v1169_v7 = vunpack.c.0.s8 (!%p3331_p7), %v1168_v2 }
 0x30b   : > { %v1140_v8 = vsub.s32 %v1137_v3, %v1139_v4 }
 0x30c   : > { %v1172_v14 = vsub.s32 %v1169_v7, %v1139_v4 }
 0x30d   : > { %3456 = vmatmul.mubr.msk.f32.vlgmr.msra.gmra.mrb[0].mxu0 %vm1048_vm5, %v1036_v56 }
 0x3e0   : > { %v1118_v58 = vpop.f32.mrb[0].mxu0 }
 0x3e1   : > { %v1119_v59 = vadd.f32 %v3332_v57, %v1118_v58  ;;  %v3457_v60 = vpop.f32.mrb[1].mxu0 }
 0x3e3   : > { %v1122_v61 = vmul.f32 0.35355338, %v1119_v59 }
 0x3e5   : > { %1130 = vrot.lane.b32.xlu1 %v1122_v61, %s4324_s4  ;;  %1124 = vrot.lane.b32.xlu0 %v1122_v61, %s4325_s14 }
 0x3e9   : > { %1127 = vrot.lane.b32.xlu0 %v1122_v61, %s4326_s21 }
 0x457   : > { %v1131_v5 = vpop.permute.xlu1 %1130  ;;  %v1125_v6 = vpop.permute.xlu0 %1124 }
 0x458   : > { %v1149_v9 = vcombine.low %v1125_v6, %v1131_v5  ;;  %v1150_v10 = vcombine.high %v1125_v6, %v1131_v5 }
 0x45a   : > { %v1157_v15 = vrot.slane %v1149_v9, %v1140_v8  ;;  %v1164_v16 = vrot.slane %v1150_v10, %v1140_v8 }
 0x45b   : > { %v1128_v11 = vpop.permute.xlu0 %1127 }
 0x45c   : > { %v1133_v12 = vcombine.low %v1122_v61, %v1128_v11  ;;  %v1134_v13 = vcombine.high %v1122_v61, %v1128_v11 }
 0x45e   : > { %v1141_v17 = vrot.slane %v1133_v12, %v1140_v8  ;;  %v1148_v18 = vrot.slane %v1134_v13, %v1140_v8 }
 0x460   : > { %v1165_v19 = vcombine.low %v1141_v17, %v1157_v15  ;;  %v1166_v20 = vcombine.high %v1141_v17, %v1157_v15  ;;  %v1181_v21 = vcombine.low %v1148_v18, %v1164_v16  ;;  %v1182_v22 = vcombine.high %v1148_v18, %v1164_v16 }
 0x462   : > { %v1173_v23 = vrot.slane %v1165_v19, %v1172_v14  ;;  %v1180_v24 = vrot.slane %v1166_v20, %v1172_v14  ;;  %v1189_v25 = vrot.slane %v1181_v21, %v1172_v14  ;;  %v1196_v26 = vrot.slane %v1182_v22, %v1172_v14 }
 0x464   : > { %v1201_v27 = vcombine.low %v1173_v23, %v1180_v24  ;;  %v3334_v28 = vcombine.high %v1173_v23, %v1180_v24  ;;  %v1217_v29 = vcombine.low %v1189_v25, %v1196_v26  ;;  %v3335_v30 = vcombine.high %v1189_v25, %v1196_v26 }
 0x466   : > { %v1208_v31 = vrot.slane %v1201_v27, %v1140_v8  ;;  %v1216_v32 = vrot.slane %v3334_v28, %v1140_v8  ;;  %v1224_v34 = vrot.slane %v1217_v29, %v1140_v8  ;;  %v1232_v35 = vrot.slane %v3335_v30, %v1140_v8 }
 0x468   : > { %v1233_v36 = vcombine.low %v1208_v31, %v1216_v32  ;;  %v1234_v37 = vcombine.high %v1208_v31, %v1216_v32  ;;  %v1249_v38 = vcombine.low %v1224_v34, %v1232_v35  ;;  %v1250_v39 = vcombine.high %v1224_v34, %v1232_v35 }
 0x46a   : > { %v1241_v33 = vrot.slane %v1233_v36, %v1172_v14  ;;  %v1248_v41 = vrot.slane %v1234_v37, %v1172_v14  ;;  %v1257_v42 = vrot.slane %v1249_v38, %v1172_v14  ;;  %v1264_v43 = vrot.slane %v1250_v39, %v1172_v14 }
 0x46c   : > { %v1265_v44 = vcombine.low %v1241_v33, %v1257_v42  ;;  %v1266_v45 = vcombine.high %v1241_v33, %v1257_v42  ;;  %v1267_v46 = vcombine.low %v1248_v41, %v1264_v43  ;;  %v1268_v47 = vcombine.high %v1248_v41, %v1264_v43 }
 0x46e   : > { %1270 = vst.msk [vmem:[#allocation2] sm:$0xff] %vm1269_vm6, %v1265_v44  ;;  %1271 = vst.msk [vmem:[#allocation2 + $0x8] sm:$0xff] %vm1269_vm6, %v1266_v45 }
 0x46f   : > { %1272 = vst.msk [vmem:[#allocation2 + $0x10] sm:$0xff] %vm1269_vm6, %v1267_v46  ;;  %1273 = vst.msk [vmem:[#allocation2 + $0x18] sm:$0xff] %vm1269_vm6, %v1268_v47 }
 0x470 PF: > { %s5300_s11 = sld [smem:[#allocation38_spill]]  ;;  %s5301_s20 = sld [smem:[#allocation37_spill]] }
 0x476   : > { %p3336_p13 = scmp.ge.s32.totalorder %s5301_s20, %s5300_s11 }
 0x477   : > { %s5302_s13 = sld [smem:[#allocation37_spill]] (!%p3336_p13)  ;;  %vm1306_vm7 = vcmask (!%p3336_p13), 64512   ;;  %v4329_v48 = vmov (!%p3336_p13), 0.0   ;;  %vm4330_vm8 = vmmov (!%p3336_p13), 0   ;;  %v1302_v50 = vld [vmem:[#allocation2] sm:$0xff] (!%p3336_p13)  ;;  %v1303_v51 = vld [vmem:[#allocation2 + $0x8] sm:$0xff] (!%p3336_p13) }
 0x478   : > { %1290 = sbr.rel (%p3336_p13) target bundleno = 1882 (0x75a), region = 112  ;;  %3458 = vmatprep.subr.mxu0 (!%p3336_p13), %v4329_v48  ;;  %3460 = vmatprep.mubr.msk.f32.mxu0 (!%p3336_p13), %vm4330_vm8, %v4329_v48  ;;  %v1304_v54 = vld [vmem:[#allocation2 + $0x10] sm:$0xff] (!%p3336_p13)  ;;  %v1305_v55 = vld [vmem:[#allocation2 + $0x18] sm:$0xff] (!%p3336_p13)  ;;  %v4331_v4 = vmov (!%p3336_p13), 0   ;;  %v1611_v5 = vld [vmem:[#allocation5] sm:$0xff] (!%p3336_p13)  ;;  %vm1699_vm9 = vcmask (!%p3336_p13), 7168  }
 0x479   : > { %3463 = vmatprep.subr.mxu1 (!%p3336_p13), %v4329_v48  ;;  %3465 = vmatprep.mubr.msk.f32.mxu1 (!%p3336_p13), %vm4330_vm8, %v4329_v48  ;;  %v4972_v8 = vld [vmem:[#allocation5 + $0x8] sm:$0xff] (!%p3336_p13)  ;;  %v1613_v9 = vld [vmem:[#allocation5 + $0x10] sm:$0xff] (!%p3336_p13)  ;;  %v4976_v16 = vld [vmem:[#allocation5 + $0x18] sm:$0xff] (!%p3336_p13) }
 0x47a   : > { %3808 = vset.pattern.permute.xlu0 (!%p3336_p13), %v4331_v4  ;;  %3809 = vset.pattern.permute.xlu1 (!%p3336_p13), %v4331_v4 }
 0x47d   : > { %s3337_s12 = sshll.u32 (!%p3336_p13), %s5302_s13, 5 }
 0x47e   : > { %s1292_s3 = scalar_lea.vmem (!%p3336_p13), [#allocation3], %s3337_s12  ;;  %s4986_s1 = scalar_lea.vmem (!%p3336_p13), [#allocation4], %s3337_s12 }
 0x47f   : > { %v1293_v40 = vld [vmem:[%s1292_s3] sm:$0xff]  ;;  %v1294_v49 = vld [vmem:[%s1292_s3 + $0x8] sm:$0xff]  ;;  %v1295_v52 = vld [vmem:[%s1292_s3 + $0x10] sm:$0xff] }
 0x480   : > { %3459 = vmatpush3.xpose.msk.msra.mxu0 %vm1306_vm7, %v1293_v40  ;;  %3464 = vmatpush3.xpose.msk.msra.mxu1 %vm1306_vm7, %v1294_v49  ;;  %v1296_v53 = vld [vmem:[%s1292_s3 + $0x18] sm:$0xff]  ;;  %v1298_v22 = vld [vmem:[%s4986_s1] sm:$0xff]  ;;  %v1299_v24 = vld [vmem:[%s4986_s1 + $0x8] sm:$0xff] }
 0x481   : > { %3468 = vmatprep.subr.mxu0 %v4329_v48  ;;  %3473 = vmatprep.subr.mxu1 %v4329_v48  ;;  %v1300_v37 = vld [vmem:[%s4986_s1 + $0x10] sm:$0xff]  ;;  %v1301_v41 = vld [vmem:[%s4986_s1 + $0x18] sm:$0xff] }
 0x483   : > { %3461 = vmatmul.mubr.msk.f32.vlgmr.msra.gmra.mrb[0].mxu0 %vm1306_vm7, %v1302_v50  ;;  %3466 = vmatmul.mubr.msk.f32.vlgmr.msra.gmra.mrb[0].mxu1 %vm1306_vm7, %v1303_v51 }
 0x484   : > { %3469 = vmatpush3.xpose.msk.msra.mxu0 %vm1306_vm7, %v1295_v52  ;;  %3470 = vmatprep.mubr.msk.f32.mxu0 %vm4330_vm8, %v4329_v48 }
 0x485   : > { %3474 = vmatpush3.xpose.msk.msra.mxu1 %vm1306_vm7, %v1296_v53  ;;  %3475 = vmatprep.mubr.msk.f32.mxu1 %vm4330_vm8, %v4329_v48 }
 0x486   : > { %3478 = vmatprep.subr.mxu0 %v4329_v48  ;;  %3483 = vmatprep.subr.mxu1 %v4329_v48 }
 0x487   : > { %3471 = vmatmul.mubr.msk.f32.vlgmr.msra.gmra.mrb[2].mxu0 %vm1306_vm7, %v1304_v54  ;;  %v1675_v54 = vld [vmem:[#allocation6] sm:$0xff] }
 0x488   : > { %3476 = vmatmul.mubr.msk.f32.vlgmr.msra.gmra.mrb[2].mxu1 %vm1306_vm7, %v1305_v55  ;;  %3480 = vmatprep.mubr.msk.f32.mxu0 %vm4330_vm8, %v4329_v48 }
 0x489   : > { %3485 = vmatprep.mubr.msk.f32.mxu1 %vm4330_vm8, %v4329_v48  ;;  %3479 = vmatpush3.msra.mxu0 %v1298_v22 }
 0x48a   : > { %3488 = vmatprep.subr.mxu0 %v4329_v48  ;;  %3484 = vmatpush3.msra.mxu1 %v1299_v24 }
 0x48b   : > { %3493 = vmatprep.subr.mxu1 %v4329_v48 }
 0x556   : > { %v1379_v56 = vpop.f32.mrb[0].mxu0  ;;  %v1455_v57 = vpop.f32.mrb[0].mxu1 }
 0x557   : > { %v3462_v58 = vpop.f32.mrb[1].mxu0  ;;  %v1615_v59 = vsel %vm1306_vm7, %v1379_v56, -inf  ;;  %v3467_v60 = vpop.f32.mrb[1].mxu1  ;;  %v1618_v61 = vsel %vm1306_vm7, %v1455_v57, -inf }
 0x558   : > { %1616 = vmax.xlane.f32.xlu0 %v1615_v59 }
 0x55a   : > { %v1531_v62 = vpop.f32.mrb[2].mxu0 }
 0x55b   : > { %v3472_v63 = vpop.f32.mrb[3].mxu0  ;;  %v1621_v0 = vsel %vm1306_vm7, %v1531_v62, -inf  ;;  %v1607_v1 = vpop.f32.mrb[2].mxu1 }
 0x55c   : > { %1619 = vmax.xlane.f32.xlu0 %v1618_v61  ;;  %1622 = vmax.xlane.f32.xlu1 %v1621_v0  ;;  %v3477_v2 = vpop.f32.mrb[3].mxu1  ;;  %v1624_v3 = vsel %vm1306_vm7, %v1607_v1, -inf  ;;  %v1677_v63 = vld [vmem:[#allocation6 + $0x10] sm:$0xff] }
 0x55d   : > { %v1678_v2 = vld [vmem:[#allocation6 + $0x18] sm:$0xff] }
 0x560   : > { %1625 = vmax.xlane.f32.xlu1 %v1624_v3 }
 0x5e5   : > { %v1617_v6 = vpop.xlane.xlu0 %1616 }
 0x5e6   : > { %v1627_v7 = vmax.f32 %v1611_v5, %v1617_v6 }
 0x5e8   : > { %v1631_v10 = vsub.f32 %v1611_v5, %v1627_v7  ;;  %2032 = vst.msk [vmem:[#allocation5] sm:$0xff] %vm1699_vm9, %v1627_v7  ;;  %1645 = vperm.xlu0 %3808, %v1627_v7   ;;  %v1704_v7 = vld [vmem:[#allocation7] sm:$0xff] }
 0x5e9   : > { %v1620_v11 = vpop.xlane.xlu0 %1619  ;;  %v1623_v12 = vpop.xlane.xlu1 %1622 }
 0x5ea   : > { %v1635_v13 = vmul.f32 1.442695, %v1631_v10  ;;  %v1628_v14 = vmax.f32 %v4972_v8, %v1620_v11  ;;  %v1629_v15 = vmax.f32 %v1613_v9, %v1623_v12 }
 0x5ec   : > { %3810 = vpow2.f32 %v1635_v13  ;;  %v1632_v17 = vsub.f32 %v4972_v8, %v1628_v14  ;;  %2033 = vst.msk [vmem:[#allocation5 + $0x8] sm:$0xff] %vm1699_vm9, %v1628_v14  ;;  %1650 = vperm.xlu1 %3809, %v1628_v14   ;;  %v1633_v18 = vsub.f32 %v1613_v9, %v1629_v15  ;;  %2034 = vst.msk [vmem:[#allocation5 + $0x10] sm:$0xff] %vm1699_vm9, %v1629_v15  ;;  %v1705_v9 = vld [vmem:[#allocation7 + $0x8] sm:$0xff] }
 0x5ed   : > { %v1626_v19 = vpop.xlane.xlu1 %1625 }
 0x5ee   : > { %v1630_v20 = vmax.f32 %v4976_v16, %v1626_v19  ;;  %v1639_v43 = vmul.f32 1.442695, %v1633_v18  ;;  %v1637_v47 = vmul.f32 1.442695, %v1632_v17 }
 0x5f0   : > { %1655 = vperm.xlu1 %3809, %v1629_v15   ;;  %v1634_v21 = vsub.f32 %v4976_v16, %v1630_v20  ;;  %2035 = vst.msk [vmem:[#allocation5 + $0x18] sm:$0xff] %vm1699_vm9, %v1630_v20  ;;  %v1706_v15 = vld [vmem:[#allocation7 + $0x10] sm:$0xff] }
 0x5f4   : > { %1660 = vperm.xlu1 %3809, %v1630_v20   ;;  %v1707_v20 = vld [vmem:[#allocation7 + $0x18] sm:$0xff] }
 0x5f6   : > { %v3811_v23 = vpop.eup %3810 }
 0x5f7   : > { %v1679_v55 = vmul.f32 %v3811_v23, %v1675_v54 }
 0x5f8   : > { %1710 = vperm.xlu1 %3809, %v3811_v23  }
 0x667   : > { %v1646_v25 = vpop.permute.xlu0 %1645 }
 0x668   : > { %v1663_v26 = vsub.f32 %v1379_v56, %v1646_v25 }
 0x66a   : > { %v1667_v27 = vmul.f32 1.442695, %v1663_v26 }
 0x66b   : > { %v1651_v28 = vpop.permute.xlu1 %1650 }
 0x66c   : > { %3812 = vpow2.f32 %v1667_v27  ;;  %v1664_v29 = vsub.f32 %v1455_v57, %v1651_v28  ;;  %v1676_v57 = vld [vmem:[#allocation6 + $0x8] sm:$0xff] }
 0x66e   : > { %v1669_v30 = vmul.f32 1.442695, %v1664_v29 }
 0x66f   : > { %v1656_v31 = vpop.permute.xlu1 %1655 }
 0x670   : > { %3814 = vpow2.f32 %v1669_v30  ;;  %v1665_v32 = vsub.f32 %v1531_v62, %v1656_v31 }
 0x672   : > { %v1671_v34 = vmul.f32 1.442695, %v1665_v32 }
 0x673   : > { %v1661_v35 = vpop.permute.xlu1 %1660 }
 0x674   : > { %3816 = vpow2.f32 %v1671_v34  ;;  %v1666_v36 = vsub.f32 %v1607_v1, %v1661_v35 }
 0x676   : > { %v3813_v38 = vpop.eup %3812  ;;  %v1673_v39 = vmul.f32 1.442695, %v1666_v36 }
 0x677   : > { %3481 = vmatmul.mubr.msk.f32.vlgmr.msra.gmra.mrb[4].mxu0 %vm1306_vm7, %v3813_v38  ;;  %v1683_v33 = vsel %vm1306_vm7, %v3813_v38, 0.0  ;;  %v1711_v53 = vpop.permute.xlu1 %1710 }
 0x678   : > { %3818 = vpow2.f32 %v1673_v39  ;;  %1684 = vadd.xlane.f32.xlu1 %v1683_v33  ;;  %3489 = vmatpush3.msra.mxu0 %v1300_v37  ;;  %v1728_v8 = vmul.f32 %v1711_v53, %v1704_v7 }
 0x679   : > { %3490 = vmatprep.mubr.msk.f32.mxu0 %vm4330_vm8, %v4329_v48  ;;  %3820 = vpow2.f32 %v1639_v43 }
 0x67a   : > { %v3815_v42 = vpop.eup %3814  ;;  %3822 = vpow2.f32 %v1637_v47 }
 0x67b   : > { %3486 = vmatmul.mubr.msk.f32.vlgmr.msra.gmra.mrb[4].mxu1 %vm1306_vm7, %v3815_v42  ;;  %v1686_v44 = vsel %vm1306_vm7, %v3815_v42, 0.0 }
 0x67c   : > { %1687 = vadd.xlane.f32.xlu0 %v1686_v44  ;;  %3494 = vmatpush3.msra.mxu1 %v1301_v41 }
 0x67d   : > { %3495 = vmatprep.mubr.msk.f32.mxu1 %vm4330_vm8, %v4329_v48  ;;  %v1641_v48 = vmul.f32 1.442695, %v1634_v21 }
 0x67e   : > { %v3817_v45 = vpop.eup %3816 }
 0x67f   : > { %3491 = vmatmul.mubr.msk.f32.vlgmr.msra.gmra.mrb[6].mxu0 %vm1306_vm7, %v3817_v45  ;;  %v1689_v50 = vsel %vm1306_vm7, %v3817_v45, 0.0  ;;  %3824 = vpow2.f32 %v1641_v48 }
 0x682   : > { %v3819_v46 = vpop.eup %3818 }
 0x683   : > { %3496 = vmatmul.mubr.msk.f32.vlgmr.msra.gmra.mrb[6].mxu1 %vm1306_vm7, %v3819_v46  ;;  %v3821_v40 = vpop.eup %3820  ;;  %v1692_v51 = vsel %vm1306_vm7, %v3819_v46, 0.0 }
 0x684   : > { %v3823_v49 = vpop.eup %3822  ;;  %v1681_v0 = vmul.f32 %v3821_v40, %v1677_v63 }
 0x685   : > { %v1680_v59 = vmul.f32 %v3823_v49, %v1676_v57 }
 0x689   : > { %1720 = vperm.xlu1 %3809, %v3821_v40   ;;  %v3825_v52 = vpop.eup %3824 }
 0x68a   : > { %v1682_v4 = vmul.f32 %v3825_v52, %v1678_v2 }
 0x692   : > { %1715 = vperm.xlu0 %3808, %v3823_v49  }
 0x6ad   : > { %1690 = vadd.xlane.f32.xlu1 %v1689_v50 }
 0x6b1   : > { %1693 = vadd.xlane.f32.xlu1 %v1692_v51 }
 0x6c2   : > { %1725 = vperm.xlu1 %3809, %v3825_v52  }
 0x705   : > { %v1685_v56 = vpop.xlane.xlu1 %1684 }
 0x706   : > { %v1695_v58 = vadd.f32 %v1685_v56, %v1679_v55 }
 0x708   : > { %1700 = vst.msk [vmem:[#allocation6] sm:$0xff] %vm1699_vm9, %v1695_v58 }
 0x709   : > { %v1688_v60 = vpop.xlane.xlu0 %1687  ;;  %v1721_v62 = vpop.permute.xlu1 %1720 }
 0x70a   : > { %v1696_v61 = vadd.f32 %v1688_v60, %v1680_v59  ;;  %v1730_v19 = vmul.f32 %v1721_v62, %v1706_v15 }
 0x70c   : > { %1701 = vst.msk [vmem:[#allocation6 + $0x8] sm:$0xff] %vm1699_vm9, %v1696_v61 }
 0x711   : > { %v1716_v10 = vpop.permute.xlu0 %1715 }
 0x712   : > { %v1729_v14 = vmul.f32 %v1716_v10, %v1705_v9 }
 0x73a   : > { %v1691_v1 = vpop.xlane.xlu1 %1690 }
 0x73b   : > { %v1697_v3 = vadd.f32 %v1691_v1, %v1681_v0 }
 0x73d   : > { %1702 = vst.msk [vmem:[#allocation6 + $0x10] sm:$0xff] %vm1699_vm9, %v1697_v3 }
 0x73e   : > { %v1694_v5 = vpop.xlane.xlu1 %1693 }
 0x73f   : > { %v1698_v6 = vadd.f32 %v1694_v5, %v1682_v4 }
 0x741   : > { %1703 = vst.msk [vmem:[#allocation6 + $0x18] sm:$0xff] %vm1699_vm9, %v1698_v6 }
 0x742   : > { %v1726_v21 = vpop.permute.xlu1 %1725 }
 0x743   : > { %v1731_v25 = vmul.f32 %v1726_v21, %v1707_v20 }
 0x74a   : > { %v1801_v11 = vpop.f32.mrb[4].mxu0 }
 0x74b   : > { %v2024_v12 = vadd.f32 %v1801_v11, %v1728_v8  ;;  %v3482_v13 = vpop.f32.mrb[5].mxu0 }
 0x74d   : > { %2028 = vst.msk [vmem:[#allocation7] sm:$0xff] %vm1306_vm7, %v2024_v12 }
 0x74e   : > { %v1874_v16 = vpop.f32.mrb[4].mxu1 }
 0x74f   : > { %v2025_v17 = vadd.f32 %v1874_v16, %v1729_v14  ;;  %v3487_v18 = vpop.f32.mrb[5].mxu1 }
 0x751   : > { %2029 = vst.msk [vmem:[#allocation7 + $0x8] sm:$0xff] %vm1306_vm7, %v2025_v17 }
 0x752   : > { %v1947_v22 = vpop.f32.mrb[6].mxu0 }
 0x753   : > { %v2026_v23 = vadd.f32 %v1947_v22, %v1730_v19  ;;  %v3492_v24 = vpop.f32.mrb[7].mxu0 }
 0x755   : > { %2030 = vst.msk [vmem:[#allocation7 + $0x10] sm:$0xff] %vm1306_vm7, %v2026_v23 }
 0x756   : > { %v2020_v26 = vpop.f32.mrb[6].mxu1 }
 0x757   : > { %v2027_v27 = vadd.f32 %v2020_v26, %v1731_v25  ;;  %v3497_v28 = vpop.f32.mrb[7].mxu1 }
 0x759   : > { %2031 = vst.msk [vmem:[#allocation7 + $0x18] sm:$0xff] %vm1306_vm7, %v2027_v27 }
 0x75a PF: > { %s5303_s9 = sld [smem:[#allocation38_spill]]  ;;  %s5304_s26 = sld [smem:[#allocation37_spill]] }
 0x760   : > { %p3350_p3 = scmp.ne.s32.totalorder %s5304_s26, %s5303_s9 }
 0x761   : > { %s5305_s6 = sld [smem:[#allocation37_spill]] (!%p3350_p3)  ;;  %vm2055_vm10 = vcmask (!%p3350_p3), 64512   ;;  %v4332_v29 = vmov (!%p3350_p3), 0.0   ;;  %vm4333_vm11 = vmmov (!%p3350_p3), 0   ;;  %v2051_v32 = vld [vmem:[#allocation2] sm:$0xff] (!%p3350_p3)  ;;  %v2053_v34 = vld [vmem:[#allocation2 + $0x10] sm:$0xff] (!%p3350_p3)  ;;  %v2360_v39 = vlaneseq (!%p3350_p3) }
 0x762   : > { %2039 = sbr.rel (%p3350_p3) target bundleno = 3057 (0xbf1), region = 116  ;;  %3498 = vmatprep.subr.mxu1 (!%p3350_p3), %v4332_v29  ;;  %3508 = vmatprep.subr.mxu0 (!%p3350_p3), %v4332_v29  ;;  %v2052_v36 = vld [vmem:[#allocation2 + $0x8] sm:$0xff] (!%p3350_p3)  ;;  %v2054_v38 = vld [vmem:[#allocation2 + $0x18] sm:$0xff] (!%p3350_p3)  ;;  %v4334_v57 = vmov (!%p3350_p3), 0   ;;  %v5060_v58 = vld [vmem:[#allocation5 + $0x10] sm:$0xff] (!%p3350_p3)  ;;  %vm2459_vm13 = vcmask (!%p3350_p3), 7168  }
 0x763   : > { %3500 = vmatprep.mubr.msk.f32.mxu1 (!%p3350_p3), %vm4333_vm11, %v4332_v29  ;;  %3510 = vmatprep.mubr.msk.f32.mxu0 (!%p3350_p3), %vm4333_vm11, %v4332_v29  ;;  %v5045_v33 = vshrl.u32 (!%p3350_p3), %v2360_v39, 7  ;;  %v2363_v41 = vand.u32 (!%p3350_p3), 127, %v2360_v39  ;;  %v5062_v59 = vld [vmem:[#allocation5] sm:$0xff] (!%p3350_p3)  ;;  %v5070_v0 = vld [vmem:[#allocation5 + $0x8] sm:$0xff] (!%p3350_p3)  ;;  %v2374_v5 = vld [vmem:[#allocation5 + $0x18] sm:$0xff] (!%p3350_p3)  ;;  %s4338_s4 = smov (!%p3350_p3), 16  }
 0x764   : > { %3827 = vset.pattern.permute.xlu1 (!%p3350_p3), %v4334_v57  ;;  %3826 = vset.pattern.permute.xlu0 (!%p3350_p3), %v4334_v57  ;;  %s4339_s14 = smov (!%p3350_p3), 8   ;;  %s4340_s21 = smov (!%p3350_p3), 24   ;;  %vm2981_vm14 = vcmask (!%p3350_p3), 130048   ;;  %vm2983_vm15 = vcmask (!%p3350_p3), 195584   ;;  %vm2996_vm0 = vcmask (!%p3350_p3), 261120  }
 0x765   : > { %vm2364_vm12 = vcmp.ge.s32.totalorder (!%p3350_p3), %v5045_v33, %v2363_v41 }
 0x767   : > { %s3351_s27 = sshll.u32 (!%p3350_p3), %s5305_s6, 5 }
 0x768   : > { %s2041_s19 = scalar_lea.vmem (!%p3350_p3), [#allocation3], %s3351_s27  ;;  %s5088_s2 = scalar_lea.vmem (!%p3350_p3), [#allocation4], %s3351_s27 }
 0x769   : > { %v2042_v30 = vld [vmem:[%s2041_s19] sm:$0xff]  ;;  %v2044_v31 = vld [vmem:[%s2041_s19 + $0x10] sm:$0xff]  ;;  %v2043_v35 = vld [vmem:[%s2041_s19 + $0x8] sm:$0xff] }
 0x76a   : > { %3499 = vmatpush3.xpose.msk.msra.mxu1 %vm2055_vm10, %v2042_v30  ;;  %3509 = vmatpush3.xpose.msk.msra.mxu0 %vm2055_vm10, %v2044_v31  ;;  %v2045_v37 = vld [vmem:[%s2041_s19 + $0x18] sm:$0xff]  ;;  %v2047_v10 = vld [vmem:[%s5088_s2] sm:$0xff]  ;;  %v2048_v11 = vld [vmem:[%s5088_s2 + $0x8] sm:$0xff] }
 0x76b   : > { %3503 = vmatprep.subr.mxu1 %v4332_v29  ;;  %3518 = vmatprep.subr.mxu0 %v4332_v29  ;;  %v2049_v24 = vld [vmem:[%s5088_s2 + $0x10] sm:$0xff]  ;;  %v2050_v30 = vld [vmem:[%s5088_s2 + $0x18] sm:$0xff] }
 0x76d   : > { %3501 = vmatmul.mubr.msk.f32.vlgmr.msra.gmra.mrb[0].mxu1 %vm2055_vm10, %v2051_v32  ;;  %3511 = vmatmul.mubr.msk.f32.vlgmr.msra.gmra.mrb[0].mxu0 %vm2055_vm10, %v2053_v34 }
 0x76e   : > { %3504 = vmatpush3.xpose.msk.msra.mxu1 %vm2055_vm10, %v2043_v35  ;;  %3505 = vmatprep.mubr.msk.f32.mxu1 %vm4333_vm11, %v4332_v29 }
 0x76f   : > { %3513 = vmatprep.subr.mxu1 %v4332_v29  ;;  %3520 = vmatprep.mubr.msk.f32.mxu0 %vm4333_vm11, %v4332_v29 }
 0x770   : > { %3519 = vmatpush3.msra.mxu0 %v2047_v10 }
 0x771   : > { %3506 = vmatmul.mubr.msk.f32.vlgmr.msra.gmra.mrb[2].mxu1 %vm2055_vm10, %v2052_v36  ;;  %3528 = vmatprep.subr.mxu0 %v4332_v29 }
 0x772   : > { %3514 = vmatpush3.xpose.msk.msra.mxu1 %vm2055_vm10, %v2045_v37  ;;  %3515 = vmatprep.mubr.msk.f32.mxu1 %vm4333_vm11, %v4332_v29 }
 0x773   : > { %3523 = vmatprep.subr.mxu1 %v4332_v29 }
 0x775   : > { %3516 = vmatmul.mubr.msk.f32.vlgmr.msra.gmra.mrb[4].mxu1 %vm2055_vm10, %v2054_v38 }
 0x776   : > { %3525 = vmatprep.mubr.msk.f32.mxu1 %vm4333_vm11, %v4332_v29  ;;  %3524 = vmatpush3.msra.mxu1 %v2048_v11  ;;  %v2465_v11 = vld [vmem:[#allocation7 + $0x8] sm:$0xff] }
 0x777   : > { %3533 = vmatprep.subr.mxu1 %v4332_v29 }
 0x840   : > { %v2128_v42 = vpop.f32.mrb[0].mxu1  ;;  %v2280_v43 = vpop.f32.mrb[0].mxu0 }
 0x841   : > { %v2367_v44 = vsel %vm2364_vm12, %v2128_v42, -1e+30  ;;  %v2369_v45 = vsel %vm2364_vm12, %v2280_v43, -1e+30  ;;  %v3502_v46 = vpop.f32.mrb[1].mxu1  ;;  %v3512_v47 = vpop.f32.mrb[1].mxu0 }
 0x842   : > { %v2381_v40 = vsel %vm2055_vm10, %v2369_v45, -inf  ;;  %v2375_v49 = vsel %vm2055_vm10, %v2367_v44, -inf  ;;  %v2436_v47 = vld [vmem:[#allocation6 + $0x8] sm:$0xff] }
 0x843   : > { %2382 = vmax.xlane.f32.xlu1 %v2381_v40  ;;  %2376 = vmax.xlane.f32.xlu0 %v2375_v49  ;;  %v2437_v40 = vld [vmem:[#allocation6 + $0x10] sm:$0xff] }
 0x844   : > { %v2204_v50 = vpop.f32.mrb[2].mxu1 }
 0x845   : > { %v2368_v51 = vsel %vm2364_vm12, %v2204_v50, -1e+30  ;;  %v3507_v48 = vpop.f32.mrb[3].mxu1 }
 0x846   : > { %v2378_v52 = vsel %vm2055_vm10, %v2368_v51, -inf }
 0x847   : > { %2379 = vmax.xlane.f32.xlu0 %v2378_v52 }
 0x848   : > { %v2356_v53 = vpop.f32.mrb[4].mxu1 }
 0x849   : > { %v2370_v54 = vsel %vm2364_vm12, %v2356_v53, -1e+30  ;;  %v3517_v55 = vpop.f32.mrb[5].mxu1  ;;  %v2438_v53 = vld [vmem:[#allocation6 + $0x18] sm:$0xff] }
 0x84a   : > { %v2384_v56 = vsel %vm2055_vm10, %v2370_v54, -inf }
 0x84b   : > { %2385 = vmax.xlane.f32.xlu1 %v2384_v56 }
 0x8d0   : > { %v2383_v60 = vpop.xlane.xlu1 %2382  ;;  %v2377_v61 = vpop.xlane.xlu0 %2376 }
 0x8d1   : > { %v5065_v62 = vmax.f32 %v5060_v58, %v2383_v60  ;;  %v5068_v63 = vmax.f32 %v5062_v59, %v2377_v61 }
 0x8d3   : > { %v2393_v1 = vsub.f32 %v5060_v58, %v5065_v62  ;;  %2794 = vst.msk [vmem:[#allocation5 + $0x10] sm:$0xff] %vm2459_vm13, %v5065_v62  ;;  %v2391_v2 = vsub.f32 %v5062_v59, %v5068_v63  ;;  %2792 = vst.msk [vmem:[#allocation5] sm:$0xff] %vm2459_vm13, %v5068_v63  ;;  %2405 = vperm.xlu0 %3826, %v5068_v63   ;;  %2415 = vperm.xlu1 %3827, %v5065_v62  }
 0x8d4   : > { %v2380_v3 = vpop.xlane.xlu0 %2379 }
 0x8d5   : > { %v2388_v4 = vmax.f32 %v5070_v0, %v2380_v3  ;;  %v2395_v36 = vmul.f32 1.442695, %v2391_v2  ;;  %v2399_v38 = vmul.f32 1.442695, %v2393_v1  ;;  %v2985_v3 = vld [vmem:[#allocation22] sm:$0xff] }
 0x8d7   : > { %v2392_v6 = vsub.f32 %v5070_v0, %v2388_v4  ;;  %2793 = vst.msk [vmem:[#allocation5 + $0x8] sm:$0xff] %vm2459_vm13, %v2388_v4  ;;  %2410 = vperm.xlu1 %3827, %v2388_v4   ;;  %v2986_v4 = vld [vmem:[#allocation22 + $0x8] sm:$0xff] }
 0x8d8   : > { %v2386_v7 = vpop.xlane.xlu1 %2385 }
 0x8d9   : > { %v2390_v8 = vmax.f32 %v2374_v5, %v2386_v7  ;;  %v2397_v37 = vmul.f32 1.442695, %v2392_v6  ;;  %v3568_v6 = vpack.c.bf16 %v2986_v4, %v2985_v3 }
 0x8db   : > { %v2394_v9 = vsub.f32 %v2374_v5, %v2390_v8  ;;  %2795 = vst.msk [vmem:[#allocation5 + $0x18] sm:$0xff] %vm2459_vm13, %v2390_v8  ;;  %2420 = vperm.xlu1 %3827, %v2390_v8   ;;  %v4335_v5 = vmov 0.0|0.0   ;;  %v2464_v8 = vld [vmem:[#allocation7] sm:$0xff] }
 0x8dd   : > { %v2401_v39 = vmul.f32 1.442695, %v2394_v9 }
 0x952   : > { %v2406_v12 = vpop.permute.xlu0 %2405  ;;  %v2416_v13 = vpop.permute.xlu1 %2415 }
 0x953   : > { %v2423_v14 = vsub.f32 %v2367_v44, %v2406_v12  ;;  %v2425_v15 = vsub.f32 %v2369_v45, %v2416_v13  ;;  %v2435_v44 = vld [vmem:[#allocation6] sm:$0xff]  ;;  %v2466_v13 = vld [vmem:[#allocation7 + $0x10] sm:$0xff] }
 0x955   : > { %v2427_v16 = vmul.f32 1.442695, %v2423_v14  ;;  %v2431_v17 = vmul.f32 1.442695, %v2425_v15 }
 0x956   : > { %v2411_v18 = vpop.permute.xlu1 %2410 }
 0x957   : > { %3828 = vpow2.f32 %v2427_v16  ;;  %v2424_v19 = vsub.f32 %v2368_v51, %v2411_v18 }
 0x958   : > { %3830 = vpow2.f32 %v2431_v17 }
 0x959   : > { %v2429_v20 = vmul.f32 1.442695, %v2424_v19 }
 0x95a   : > { %v2421_v21 = vpop.permute.xlu1 %2420 }
 0x95b   : > { %3832 = vpow2.f32 %v2429_v20  ;;  %v2426_v22 = vsub.f32 %v2370_v54, %v2421_v21  ;;  %v2467_v20 = vld [vmem:[#allocation7 + $0x18] sm:$0xff] }
 0x95d   : > { %v2433_v23 = vmul.f32 1.442695, %v2426_v22 }
 0x95f   : > { %3834 = vpow2.f32 %v2433_v23 }
 0x960   : > { %3836 = vpow2.f32 %v2395_v36 }
 0x961   : > { %v3829_v25 = vpop.eup %3828  ;;  %3838 = vpow2.f32 %v2397_v37  ;;  %v4337_v37 = vmov 1934713408  }
 0x962   : > { %3521 = vmatmul.mubr.msk.f32.vlgmr.msra.gmra.mrb[2].mxu0 %vm2055_vm10, %v3829_v25  ;;  %v2443_v26 = vsel %vm2055_vm10, %v3829_v25, 0.0  ;;  %v3831_v27 = vpop.eup %3830  ;;  %3840 = vpow2.f32 %v2399_v38  ;;  %v2867_v38 = vunpack.c.l.s4 %v4337_v37 }
 0x963   : > { %2444 = vadd.xlane.f32.xlu1 %v2443_v26  ;;  %3529 = vmatpush3.msra.mxu0 %v2049_v24  ;;  %v2449_v31 = vsel %vm2055_vm10, %v3831_v27, 0.0  ;;  %3842 = vpow2.f32 %v2401_v39 }
 0x964   : > { %3530 = vmatprep.mubr.msk.f32.mxu0 %vm4333_vm11, %v4332_v29  ;;  %3567 = vmatprep.subr.bf16.mxu0 %v4335_v5 }
 0x965   : > { %v3833_v28 = vpop.eup %3832 }
 0x966   : > { %3526 = vmatmul.mubr.msk.f32.vlgmr.msra.gmra.mrb[6].mxu1 %vm2055_vm10, %v3833_v28  ;;  %3531 = vmatmul.mubr.msk.f32.vlgmr.msra.gmra.mrb[4].mxu0 %vm2055_vm10, %v3831_v27  ;;  %v2446_v32 = vsel %vm2055_vm10, %v3833_v28, 0.0 }
 0x967   : > { %2450 = vadd.xlane.f32.xlu1 %v2449_v31  ;;  %2447 = vadd.xlane.f32.xlu0 %v2446_v32  ;;  %v4336_v32 = vmov 1983009808  }
 0x968   : > { %3534 = vmatpush3.msra.mxu1 %v2050_v30  ;;  %3535 = vmatprep.mubr.msk.f32.mxu1 %vm4333_vm11, %v4332_v29 }
 0x969   : > { %v3835_v34 = vpop.eup %3834  ;;  %3546 = vmatprep.mubr.msk.f32.mxu0 %vm4333_vm11, %v4332_v29  ;;  %3569 = vmatpush3.bf16.msra.mxu0 %v3568_v6 }
 0x96a   : > { %3536 = vmatmul.mubr.msk.f32.vlgmr.msra.gmra.mrb[8].mxu1 %vm2055_vm10, %v3835_v34  ;;  %v2452_v35 = vsel %vm2055_vm10, %v3835_v34, 0.0  ;;  %v3837_v41 = vpop.eup %3836  ;;  %3570 = vmatprep.subr.bf16.mxu0 %v4335_v5  ;;  %v2835_v34 = vunpack.c.l.s4 %v4336_v32 }
 0x96b   : > { %2453 = vadd.xlane.f32.xlu1 %v2452_v35  ;;  %v3839_v42 = vpop.eup %3838  ;;  %v2439_v45 = vmul.f32 %v3837_v41, %v2435_v44 }
 0x96c   : > { %v3841_v29 = vpop.eup %3840  ;;  %v2440_v50 = vmul.f32 %v3839_v42, %v2436_v47  ;;  %v2836_v36 = vunpack.c.0.s8 %v2835_v34  ;;  %v3366_v34 = vld [vmem:[#allocation23] ss:$0 sm:$0xff] }
 0x96d   : > { %v3843_v43 = vpop.eup %3842  ;;  %v2441_v51 = vmul.f32 %v3841_v29, %v2437_v40 }
 0x96e   : > { %v2442_v56 = vmul.f32 %v3843_v43, %v2438_v53 }
 0x97c   : > { %2470 = vperm.xlu1 %3827, %v3837_v41  }
 0x97d   : > { %2475 = vperm.xlu0 %3826, %v3839_v42  }
 0x980   : > { %2480 = vperm.xlu1 %3827, %v3841_v29  }
 0x984   : > { %2485 = vperm.xlu1 %3827, %v3843_v43  }
 0x9f0   : > { %v2445_v46 = vpop.xlane.xlu1 %2444 }
 0x9f1   : > { %v2455_v49 = vadd.f32 %v2445_v46, %v2439_v45  ;;  %v2839_v45 = vsub.s32 %v2836_v36, %v5045_v33  ;;  %v2868_v46 = vunpack.c.0.s8 %v2867_v38 }
 0x9f3   : > { %2460 = vst.msk [vmem:[#allocation6] sm:$0xff] %vm2459_vm13, %v2455_v49 }
 0x9f4   : > { %v2448_v48 = vpop.xlane.xlu0 %2447  ;;  %v2451_v52 = vpop.xlane.xlu1 %2450 }
 0x9f5   : > { %v2456_v54 = vadd.f32 %v2448_v48, %v2440_v50  ;;  %v2457_v55 = vadd.f32 %v2451_v52, %v2441_v51 }
 0x9f7   : > { %2461 = vst.msk [vmem:[#allocation6 + $0x8] sm:$0xff] %vm2459_vm13, %v2456_v54  ;;  %2462 = vst.msk [vmem:[#allocation6 + $0x10] sm:$0xff] %vm2459_vm13, %v2457_v55  ;;  %v2871_v55 = vsub.s32 %v2868_v46, %v5045_v33 }
 0x9f8   : > { %v2454_v57 = vpop.xlane.xlu1 %2453 }
 0x9f9   : > { %v2458_v58 = vadd.f32 %v2454_v57, %v2442_v56 }
 0x9fa   : > { %v2796_v59 = vld [vmem:[#allocation6] sm:$0xff] }
 0x9fb   : > { %2463 = vst.msk [vmem:[#allocation6 + $0x18] sm:$0xff] %vm2459_vm13, %v2458_v58  ;;  %3844 = vrcp.f32 %v2796_v59 }
 0x9fc   : > { %v2471_v7 = vpop.permute.xlu1 %2470  ;;  %v2476_v12 = vpop.permute.xlu0 %2475 }
 0x9fd   : > { %v2488_v10 = vmul.f32 %v2471_v7, %v2464_v8  ;;  %v2489_v17 = vmul.f32 %v2476_v12, %v2465_v11 }
 0x9fe   : > { %v2797_v60 = vld [vmem:[#allocation6 + $0x8] sm:$0xff]  ;;  %v2798_v61 = vld [vmem:[#allocation6 + $0x10] sm:$0xff] }
 0x9ff   : > { %3846 = vrcp.f32 %v2797_v60 }
 0xa00   : > { %3848 = vrcp.f32 %v2798_v61  ;;  %v2481_v9 = vpop.permute.xlu1 %2480 }
 0xa01   : > { %v2490_v18 = vmul.f32 %v2481_v9, %v2466_v13 }
 0xa02   : > { %v2799_v62 = vld [vmem:[#allocation6 + $0x18] sm:$0xff] }
 0xa03   : > { %3850 = vrcp.f32 %v2799_v62 }
 0xa04   : > { %v2486_v19 = vpop.permute.xlu1 %2485 }
 0xa05   : > { %v3845_v63 = vpop.eup %3844  ;;  %v2491_v27 = vmul.f32 %v2486_v19, %v2467_v20 }
 0xa06   : > { %2810 = vperm.xlu1 %3827, %v3845_v63  }
 0xa09   : > { %v3847_v0 = vpop.eup %3846 }
 0xa0a   : > { %v3849_v1 = vpop.eup %3848  ;;  %2815 = vperm.xlu0 %3826, %v3847_v0   ;;  %v2987_v0 = vld [vmem:[#allocation22 + $0x10] sm:$0xff] }
 0xa0b   : > { %2820 = vperm.xlu1 %3827, %v3849_v1   ;;  %v2988_v1 = vld [vmem:[#allocation22 + $0x18] sm:$0xff] }
 0xa0c   : > { %v3571_v6 = vpack.c.bf16 %v2988_v1, %v2987_v0 }
 0xa0d   : > { %v3851_v2 = vpop.eup %3850 }
 0xa0e   : > { %2825 = vperm.xlu0 %3826, %v3851_v2   ;;  %3572 = vmatpush3.bf16.msra.mxu0 %v3571_v6 }
 0xa35   : > { %v2561_v14 = vpop.f32.mrb[2].mxu0 }
 0xa36   : > { %v2784_v15 = vadd.f32 %v2561_v14, %v2488_v10  ;;  %v3522_v16 = vpop.f32.mrb[3].mxu0 }
 0xa38   : > { %2788 = vst.msk [vmem:[#allocation7] sm:$0xff] %vm2055_vm10, %v2784_v15 }
 0xa39   : > { %v2634_v21 = vpop.f32.mrb[6].mxu1  ;;  %v2707_v22 = vpop.f32.mrb[4].mxu0 }
 0xa3a   : > { %v2785_v23 = vadd.f32 %v2634_v21, %v2489_v17  ;;  %v2786_v24 = vadd.f32 %v2707_v22, %v2490_v18  ;;  %v3527_v25 = vpop.f32.mrb[7].mxu1  ;;  %v3532_v26 = vpop.f32.mrb[5].mxu0 }
 0xa3c   : > { %2789 = vst.msk [vmem:[#allocation7 + $0x8] sm:$0xff] %vm2055_vm10, %v2785_v23  ;;  %2790 = vst.msk [vmem:[#allocation7 + $0x10] sm:$0xff] %vm2055_vm10, %v2786_v24 }
 0xa3d   : > { %v2780_v28 = vpop.f32.mrb[8].mxu1 }
 0xa3e   : > { %v2787_v30 = vadd.f32 %v2780_v28, %v2491_v27  ;;  %v3537_v31 = vpop.f32.mrb[9].mxu1 }
 0xa3f   : > { %v2804_v29 = vld [vmem:[#allocation7] sm:$0xff] }
 0xa40   : > { %2791 = vst.msk [vmem:[#allocation7 + $0x18] sm:$0xff] %vm2055_vm10, %v2787_v30 }
 0xa43   : > { %v2806_v41 = vld [vmem:[#allocation7 + $0x10] sm:$0xff]  ;;  %v2805_v47 = vld [vmem:[#allocation7 + $0x8] sm:$0xff] }
 0xa47   : > { %v2807_v49 = vld [vmem:[#allocation7 + $0x18] sm:$0xff] }
 0xa85   : > { %v2811_v35 = vpop.permute.xlu1 %2810 }
 0xa86   : > { %v2828_v44 = vmul.f32 %v2811_v35, %v2804_v29 }
 0xa89   : > { %v2816_v39 = vpop.permute.xlu0 %2815 }
 0xa8a   : > { %v2821_v42 = vpop.permute.xlu1 %2820  ;;  %v2829_v50 = vmul.f32 %v2816_v39, %v2805_v47 }
 0xa8b   : > { %v2830_v43 = vmul.f32 %v2821_v42, %v2806_v41 }
 0xa8d   : > { %v2826_v40 = vpop.permute.xlu0 %2825  ;;  %v2832_v51 = vcombine.low %v2828_v44, %v2830_v43  ;;  %v2833_v48 = vcombine.high %v2828_v44, %v2830_v43 }
 0xa8e   : > { %v2831_v52 = vmul.f32 %v2826_v40, %v2807_v49 }
 0xa8f   : > { %v2840_v56 = vrot.slane %v2832_v51, %v2839_v45  ;;  %v2847_v57 = vrot.slane %v2833_v48, %v2839_v45 }
 0xa90   : > { %v2848_v53 = vcombine.low %v2829_v50, %v2831_v52  ;;  %v2849_v54 = vcombine.high %v2829_v50, %v2831_v52 }
 0xa92   : > { %v2856_v58 = vrot.slane %v2848_v53, %v2839_v45  ;;  %v2863_v59 = vrot.slane %v2849_v54, %v2839_v45 }
 0xa94   : > { %v2864_v60 = vcombine.low %v2840_v56, %v2856_v58  ;;  %v2865_v61 = vcombine.high %v2840_v56, %v2856_v58  ;;  %v2880_v62 = vcombine.low %v2847_v57, %v2863_v59  ;;  %v2881_v63 = vcombine.high %v2847_v57, %v2863_v59 }
 0xa96   : > { %v2872_v2 = vrot.slane %v2864_v60, %v2871_v55  ;;  %v2879_v3 = vrot.slane %v2865_v61, %v2871_v55  ;;  %v2888_v4 = vrot.slane %v2880_v62, %v2871_v55  ;;  %v2895_v5 = vrot.slane %v2881_v63, %v2871_v55 }
 0xa98   : > { %v2900_v7 = vcombine.low %v2872_v2, %v2879_v3  ;;  %v3364_v8 = vcombine.high %v2872_v2, %v2879_v3  ;;  %v2916_v9 = vcombine.low %v2888_v4, %v2895_v5  ;;  %v3365_v10 = vcombine.high %v2888_v4, %v2895_v5 }
 0xa9a   : > { %v2907_v33 = vrot.slane %v2900_v7, %v2839_v45  ;;  %v2915_v11 = vrot.slane %v3364_v8, %v2839_v45  ;;  %v2923_v12 = vrot.slane %v2916_v9, %v2839_v45  ;;  %v2931_v13 = vrot.slane %v3365_v10, %v2839_v45 }
 0xa9c   : > { %v2933_v14 = vcombine.high %v2907_v33, %v2915_v11  ;;  %v2949_v15 = vcombine.high %v2923_v12, %v2931_v13  ;;  %v2932_v16 = vcombine.low %v2907_v33, %v2915_v11  ;;  %v2948_v17 = vcombine.low %v2923_v12, %v2931_v13 }
 0xa9e   : > { %v2947_v18 = vrot.slane %v2933_v14, %v2871_v55  ;;  %v2963_v19 = vrot.slane %v2949_v15, %v2871_v55  ;;  %v2940_v20 = vrot.slane %v2932_v16, %v2871_v55  ;;  %v2956_v21 = vrot.slane %v2948_v17, %v2871_v55 }
 0xaa0   : > { %v2966_v22 = vcombine.low %v2947_v18, %v2963_v19  ;;  %v2965_v23 = vcombine.high %v2940_v20, %v2956_v21  ;;  %v2964_v24 = vcombine.low %v2940_v20, %v2956_v21  ;;  %v2967_v25 = vcombine.high %v2947_v18, %v2963_v19 }
 0xaa2   : > { %2973 = vrot.lane.b32.xlu0 %v2966_v22, %s4338_s4  ;;  %2969 = vrot.lane.b32.xlu1 %v2965_v23, %s4339_s14 }
 0xaa6   : > { %2977 = vrot.lane.b32.xlu1 %v2967_v25, %s4340_s21 }
 0xb14   : > { %v2970_v26 = vpop.permute.xlu1 %2969  ;;  %v2974_v27 = vpop.permute.xlu0 %2973 }
 0xb15   : > { %v2980_v28 = vsel %vm2055_vm10, %v2964_v24, %v2970_v26 }
 0xb16   : > { %v2982_v31 = vsel %vm2981_vm14, %v2980_v28, %v2974_v27 }
 0xb18   : > { %v2978_v30 = vpop.permute.xlu1 %2977 }
 0xb19   : > { %v2984_v32 = vsel %vm2983_vm15, %v2982_v31, %v2978_v30 }
 0xb1a   : > { %3547 = vmatmul.mubr.msk.f32.vlgmr.msra.gmra.mrb[6].mxu0 %vm2996_vm0, %v2984_v32 }
 0xbed   : > { %v3066_v35 = vpop.f32.mrb[6].mxu0 }
 0xbee   : > { %v3067_v36 = vadd.f32 %v3366_v34, %v3066_v35  ;;  %v3548_v37 = vpop.f32.mrb[7].mxu0 }
 0xbf0   : > { %3070 = vst.msk [vmem:[%s4873_s29] sm:$0xff] %vm2996_vm0, %v3067_v36 }
 0xbf1 PF: > { %s5306_s11 = sld [smem:[#allocation39_spill]]  ;;  %s5307_s20 = sld [smem:[#allocation38_spill]] }
 0xbf2   : > { %s3087_s3 = sshll.u32 %s4873_s29, 4  ;;  %s5308_s6 = sld [smem:[#allocation53_spill]]  ;;  %s5128_s3 = int_to_ptr.vmem [resolvable:$true] %s3087_s3 }
 0xbf3   : > { %s3072_s19 = scalar_lea.sflag [#allocation10], %s4834_s5  ;;  %s4136_s2 = scalar_lea.vmem %s5128_s3, 128 }
 0xbf4   : > { %p4137_p11 = scmp.ne.s32.totalorder %s5128_s3, %s4136_s2  ;;  %p5309_p2 = scmp.ne.s32.totalorder %s5268_s10, 0 }
 0xbf5   : > { %s4341_s4 = smov [#allocation25]  }
 0xbf6   : > { %p4138_p12 = pnand %p4137_p11, %p5309_p2  ;;  %s4140_s14 = sshll.u32 %s4341_s4, 4  ;;  %s4141_s14 = int_to_ptr.vmem [resolvable:$false] %s4140_s14 }
 0xbf7   : > { %s3369_s13 = sshll.u32 %s5306_s11, 1  ;;  %s4142_s29 = scalar_lea.vmem %s4141_s14, 256 }
 0xbf8   : > { %s3083_s12 = sadd.s32 %s5307_s20, %s3369_s13  ;;  %p4139_p0 = pneg %p4138_p12 }
 0xbf9   : > { %s3370_s1 = sshll.u32 %s3083_s12, 7  ;;  %p4143_p4 = scmp.lt.s32.totalorder %s5128_s3, %s4141_s14 }
 0xbfa   : > { %s3085_s27 = scalar_lea.hbm %s5308_s6, %s3370_s1  ;;  %p4144_p8 = scmp.lt.s32.totalorder %s4142_s29, %s4136_s2 }
 0xbfc   : > { %p4145_p1 = por %p4144_p8, %p4143_p4 }
 0xbfe   : > { %p4146_p6 = pnand %p4145_p1, %p4139_p0 }
 0xc00   : > { %4149 = shalt.err (!%p4146_p6)
}
 0xc01   : > { %s4150_s21 = scalar_lea.hbm %s3085_s27, 128  ;;  %s4154_s20 = scalar_lea.hbm %s5308_s6, 512 }
 0xc02   : > { %p4151_p9 = scmp.ne.s32.totalorder %s3085_s27, %s4150_s21  ;;  %p4155_p7 = scmp.lt.u32.totalorder %s3085_s27, %s5308_s6 }
 0xc03   : > { %p4156_p13 = scmp.lt.u32.totalorder %s4154_s20, %s4150_s21  ;;  %p4158_p11 = scmp.lt.u32.totalorder %s4150_s21, %s3085_s27 }
 0xc04   : > { %p4152_p5 = pnand %p4151_p9, %p5309_p2 }
 0xc05   : > { %p4157_p3 = por %p4156_p13, %p4155_p7 }
 0xc06   : > { %p4153_p10 = pneg %p4152_p5 }
 0xc07   : > { %p4159_p12 = por %p4158_p11, %p4157_p3 }
 0xc09   : > { %p4160_p0 = pnand %p4159_p12, %p4153_p10 }
 0xc0b   : > { %4163 = shalt.err (!%p4160_p0)
}
 0xc0c   : > { %3609 = dma.vmem_to_hbm [thread:$0]  (%p5309_p2), %s5128_s3, 128, %s3085_s27, %s3072_s19  }
 0xc0d PF: > { %p3664_p4 = scmp.ge.s32.totalorder %s4298_s25, 2  ;;  %s3099_s1 = sand.u32 1, %s4262_s16  }
 0xc0e   : > { %p5310_p8 = scmp.ne.s32.totalorder %s5269_s0, 0  ;;  %s3100_s9 = scalar_lea.sflag [#allocation10], %s3099_s1 }
 0xc10   : > { %p3644_p1 = pnand %p3664_p4, %p5310_p8 }
 0xc12   : > { %4245 = dma.done.wait (!%p3644_p1), %s3100_s9, 128  }
 0xc13   : > { %4247 = vsyncadd (!%p3644_p1), %s3100_s9, 4294967168  ;;  %s33_s25 = sadd.s32 1, %s4298_s25   ;;  %s5312_s13 = sld [smem:[#allocation35_spill]] }
 0xc14   : > { %p5155_p6 = scmp.ge.s32.totalorder %s33_s25, 10   ;;  %s5313_s14 = sld [smem:[#allocation36_spill]] }
 0xc15   : > { %s5314_s10 = smov %s5331_s15  ;;  %s5315_s0 = sld [smem:[#allocation42_spill]] }
 0xc16   : > { %s5316_s15 = smov %s4778_s8  ;;  %s5317_s16 = smov %s4266_s17 }
 0xc17   : > { %s5318_s17 = smov %s4270_s18  ;;  %s5319_s18 = smov %s4715_s28 }
 0xc18   : > { %s5320_s19 = smov %s4286_s22  ;;  %s5321_s20 = smov %s4290_s23 }
 0xc19   : > { %s5322_s21 = smov %s4294_s24  ;;  %s5323_s22 = smov %s5327_s30 }
 0xc1a   : > { %s5324_s23 = smov %s5314_s10  ;;  %32 = sbr.rel (!%p5155_p6) target bundleno = 28 (0x1c), region = 172 }
 0xc1b   : > { %s5325_s24 = smov %s5315_s0 }
 0xc21   :  { %3105 = vsyncpa [#allocation9], 1 }
 0xc22   :  { %3107 = vsyncpa [#allocation9 + $0x1], 1 }
 0xc23   :  { %3108 = vsyncpa [#allocation12], 1 }
 0xc24   :  { %3110 = vsyncpa [#allocation12 + $0x1], 1 }
 0xc25   :  { %3111 = vsyncpa [#allocation15], 1 }
 0xc26   :  { %3112 = vsyncpa [#allocation18], 1 }
 0xc27   :  { %3113 = vsyncpa [#allocation21], 1 }
 0xc28   :  { %3114 = vsyncpa [#allocation24], 1 }
 0xc29   :  { %3115 = vsyncpa [#allocation10], 1 }
 0xc2a   :  { %3117 = vsyncpa [#allocation10 + $0x1], 1 }

</bundles_post_ra>
